<compile_context>
chip_gen: v7x
topology: tpu7x:2x2x1
jax: 0.10.0
libtpu: 0.0.40
codegen_flags: <defaults>
</compile_context>

<pallas_src>
import functools

import jax
import jax.numpy as jnp
from jax.experimental import pallas as pl
from jax.experimental.pallas import tpu as pltpu

LN_EPS = 1e-5


def resblock_kernel(x_ref, w1_ref, w2_ref, w3_ref, b_ref, o_ref, *, ew_dtype):
    """One (row_tile, C) slab: LN -> 3x (matmul [+bias, GELU]) -> +residual."""
    # ---- LayerNorm over channels (affine already folded into w1 / bias[0]) --
    x = x_ref[...].astype(jnp.float32)                          # (TN, C)
    mean = jnp.mean(x, axis=-1, keepdims=True)
    var = jnp.mean((x - mean) ** 2, axis=-1, keepdims=True)
    xn = ((x - mean) * jax.lax.rsqrt(var + LN_EPS)).astype(jnp.bfloat16)
    del x, mean, var          # don't keep the f32 slab live across the matmuls

    b = b_ref[...]                                               # (8, C) f32
    b_ew = b.astype(ew_dtype)

    # ---- Linear -> GELU -> Linear -> GELU -> Linear ----
    # bf16 MXU operands, f32 accumulation.  Bias-add + GELU run in ew_dtype:
    # bf16 on v6e/v7x (bf16 VPU/EUP), f32 on v5e.
    h = jnp.dot(xn, w1_ref[...], preferred_element_type=jnp.float32)
    h = jax.nn.gelu(h.astype(ew_dtype) + b_ew[0:1, :], approximate=True)
    h = jnp.dot(h.astype(jnp.bfloat16), w2_ref[...],
                preferred_element_type=jnp.float32)
    h = jax.nn.gelu(h.astype(ew_dtype) + b_ew[1:2, :], approximate=True)
    h = jnp.dot(h.astype(jnp.bfloat16), w3_ref[...],
                preferred_element_type=jnp.float32)
    h = h + b[2:3, :]                                            # final bias f32

    # ---- residual: re-read the input tile (rematerialize from VMEM rather
    # than keeping 64 f32 vregs live across the whole compute phase) ----
    o_ref[...] = (x_ref[...].astype(jnp.float32) + h).astype(o_ref.dtype)


def prepare_params(params):
    """One-time weight prep (call OUTSIDE the hot path).

    Folds the LayerNorm affine into the first Linear (exact in f32 before the
    bf16 cast), casts the three weight matrices to bf16, and packs the three
    bias vectors into one sublane-aligned (8, C) f32 slab (one DMA).
    """
    ln_g = params["ln_g"].astype(jnp.float32)
    ln_b = params["ln_b"].astype(jnp.float32)
    w1 = params["w1"].astype(jnp.float32)
    C = w1.shape[0]
    # (xn*g + b) @ w1 + b1  ==  xn @ (g[:,None]*w1) + (b @ w1 + b1)
    w1_folded = (ln_g[:, None] * w1).astype(jnp.bfloat16)
    b1_folded = params["b1"].astype(jnp.float32) + ln_b @ w1

    biases = jnp.zeros((8, C), jnp.float32)
    biases = biases.at[0].set(b1_folded)
    biases = biases.at[1].set(params["b2"].astype(jnp.float32))
    biases = biases.at[2].set(params["b3"].astype(jnp.float32))
    return {
        "w1": w1_folded,
        "w2": params["w2"].astype(jnp.bfloat16),
        "w3": params["w3"].astype(jnp.bfloat16),
        "biases": biases,
    }


def _choose_row_tile(N, row_tile):
    """Largest row tile <= row_tile that still yields >= ~8 grid steps
    (>= 4 per v7x TensorCore) so the DMA pipeline overlaps, floor 128 rows."""
    if N % 8 != 0 or N <= 128:
        return N                                   # single full-array block
    tn = min(row_tile, N)
    tn -= tn % 8                                   # sublane alignment
    while tn > 128 and pl.cdiv(N, tn) < 8:
        tn = max(128, tn // 2)
        tn -= tn % 8
    return tn


@functools.partial(jax.jit, static_argnames=("row_tile", "bf16_elementwise"))
def resblock_pallas(x, prepared, row_tile=1024, bf16_elementwise=True):
    """x: (B, S, C) float32; prepared: output of prepare_params()."""
    B, S, C = x.shape
    N = B * S
    x2 = x.reshape(N, C)

    tn = _choose_row_tile(N, row_tile)
    grid = (pl.cdiv(N, tn),)

    row_spec = pl.BlockSpec((tn, C), lambda i: (i, 0))
    # Grid-invariant operands: constant index_map, fetched once -> single
    # buffer.  At large C this is what keeps three (C,C) bf16 weights inside
    # v7x's 64 MiB VMEM instead of doubling their footprint.
    resident = pl.Buffered(1)
    mat_spec = pl.BlockSpec((C, C), lambda i: (0, 0), pipeline_mode=resident)
    bias_spec = pl.BlockSpec((8, C), lambda i: (0, 0), pipeline_mode=resident)

    # Explicit VMEM budget: double-buffered f32 in/out row blocks + resident
    # bf16 weights + packed biases, with 2x headroom for compiler scratch.
    need = 2 * 2 * tn * C * 4 + 3 * C * C * 2 + 8 * C * 4
    vmem_limit = int(min(max(2 * need, 16 << 20), 64 << 20))

    ew_dtype = jnp.bfloat16 if bf16_elementwise else jnp.float32
    kernel = functools.partial(resblock_kernel, ew_dtype=ew_dtype)

    out = pl.pallas_call(
        kernel,
        out_shape=jax.ShapeDtypeStruct((N, C), x.dtype),
        grid_spec=pltpu.PrefetchScalarGridSpec(
            num_scalar_prefetch=0,
            grid=grid,
            in_specs=[row_spec, mat_spec, mat_spec, mat_spec, bias_spec],
            out_specs=row_spec,
        ),
        compiler_params=pltpu.CompilerParams(
            dimension_semantics=("parallel",),
            vmem_limit_bytes=vmem_limit),
    )(x2, prepared["w1"], prepared["w2"], prepared["w3"], prepared["biases"])
    return out.reshape(B, S, C)


def resblock_reference(x, params):
    """Pure-JAX f32 reference mirroring the PyTorch module (exact erf GELU)."""
    mean = jnp.mean(x, axis=-1, keepdims=True)
    var = jnp.mean((x - mean) ** 2, axis=-1, keepdims=True)
    h = (x - mean) * jax.lax.rsqrt(var + LN_EPS)
    h = h * params["ln_g"] + params["ln_b"]
    h = jax.nn.gelu(h @ params["w1"] + params["b1"], approximate=False)
    h = jax.nn.gelu(h @ params["w2"] + params["b2"], approximate=False)
    h = h @ params["w3"] + params["b3"]
    return x + h


def init_params(key, ch):
    ks = jax.random.split(key, 6)
    bound = 1.0 / jnp.sqrt(ch)
    u = lambda k, shape: jax.random.uniform(k, shape, jnp.float32, -bound, bound)
    return {
        "ln_g": jnp.ones((ch,), jnp.float32),
        "ln_b": jnp.zeros((ch,), jnp.float32),
        "w1": u(ks[0], (ch, ch)), "b1": u(ks[1], (ch,)),
        "w2": u(ks[2], (ch, ch)), "b2": u(ks[3], (ch,)),
        "w3": u(ks[4], (ch, ch)), "b3": u(ks[5], (ch,)),
    }


if __name__ == "__main__":
    key = jax.random.PRNGKey(0)
    kx, kp = jax.random.split(key)

    # N = B*S = 2048 rows -> adaptive tile of 256 rows -> 8 grid steps
    # (>= 4 per v7x TensorCore, so the DMA pipeline actually overlaps).
    B, S, C = 2, 1024, 128
    x = jax.random.normal(kx, (B, S, C), jnp.float32)
    params = init_params(kp, C)

    # bf16 bias+GELU only where the VPU/EUP support bf16 (v6e/v7x); f32 on v5e
    # and older to avoid format-conversion churn.
    kind = jax.devices()[0].device_kind.lower()
    bf16_ew = not any(t in kind for t in ("v2", "v3", "v4", "v5"))

    prepared = prepare_params(params)          # one-time weight prep, not per-call
    y = resblock_pallas(x, prepared, bf16_elementwise=bf16_ew)
    jax.block_until_ready(y)

    y_ref = resblock_reference(x, params)
    # bf16 matmul operands + bf16 tanh-GELU vs the exact f32/erf reference:
    # bf16-appropriate tolerance (still catches layout/semantics bugs, which
    # produce O(1) errors).
    assert jnp.allclose(y, y_ref, atol=5e-2, rtol=5e-2), "mismatch vs reference"

    print("KERNEL_OK")
</pallas_src>

<mosaic_0001>
module attributes {stable_mosaic.version = 11 : i64} {
  func.func @resblock_kernel(%arg0: i32, %arg1: memref<256x128xf32, #tpu.memory_space<vmem>>, %arg2: memref<128x128xbf16, #tpu.memory_space<vmem>>, %arg3: memref<128x128xbf16, #tpu.memory_space<vmem>>, %arg4: memref<128x128xbf16, #tpu.memory_space<vmem>>, %arg5: memref<8x128xf32, #tpu.memory_space<vmem>>, %arg6: memref<256x128xf32, #tpu.memory_space<vmem>>) attributes {dimension_semantics = [#tpu.dimension_semantics<parallel>], iteration_bounds = array<i64: 8>, scalar_prefetch = 0 : i64, scratch_operands = 0 : i64, tpu.core_type = #tpu.core_type<tc>, window_params = [{transform_indices = @transform_0, window_bounds = array<i64: 256, 128>}, {pipeline_mode = #tpu.pipeline_mode<synchronous>, transform_indices = @transform_1, window_bounds = array<i64: 128, 128>}, {pipeline_mode = #tpu.pipeline_mode<synchronous>, transform_indices = @transform_2, window_bounds = array<i64: 128, 128>}, {pipeline_mode = #tpu.pipeline_mode<synchronous>, transform_indices = @transform_3, window_bounds = array<i64: 128, 128>}, {pipeline_mode = #tpu.pipeline_mode<synchronous>, transform_indices = @transform_4, window_bounds = array<i64: 8, 128>}, {transform_indices = @transform_5, window_bounds = array<i64: 256, 128>}]} {
    %c0 = arith.constant 0 : index
    %c0_0 = arith.constant 0 : index
    %0 = vector.load %arg1[%c0, %c0_0] : memref<256x128xf32, #tpu.memory_space<vmem>>, vector<256x128xf32>
    %cst = arith.constant dense<0.000000e+00> : vector<256xf32>
    %1 = vector.multi_reduction <add>, %0, %cst [1] : vector<256x128xf32> to vector<256xf32>
    %2 = vector.shape_cast %1 : vector<256xf32> to vector<256x1xf32>
    %cst_1 = arith.constant 1.280000e+02 : f32
    %3 = vector.broadcast %cst_1 : f32 to vector<256x1xf32>
    %4 = arith.divf %2, %3 : vector<256x1xf32>
    %5 = vector.broadcast %4 : vector<256x1xf32> to vector<256x128xf32>
    %6 = arith.subf %0, %5 : vector<256x128xf32>
    %7 = arith.mulf %6, %6 : vector<256x128xf32>
    %cst_2 = arith.constant dense<0.000000e+00> : vector<256xf32>
    %8 = vector.multi_reduction <add>, %7, %cst_2 [1] : vector<256x128xf32> to vector<256xf32>
    %9 = vector.shape_cast %8 : vector<256xf32> to vector<256x1xf32>
    %cst_3 = arith.constant 1.280000e+02 : f32
    %10 = vector.broadcast %cst_3 : f32 to vector<256x1xf32>
    %11 = arith.divf %9, %10 : vector<256x1xf32>
    %12 = vector.broadcast %4 : vector<256x1xf32> to vector<256x128xf32>
    %13 = arith.subf %0, %12 : vector<256x128xf32>
    %cst_4 = arith.constant 9.99999974E-6 : f32
    %14 = vector.broadcast %cst_4 : f32 to vector<256x1xf32>
    %15 = arith.addf %11, %14 : vector<256x1xf32>
    %16 = math.rsqrt %15 : vector<256x1xf32>
    %17 = vector.broadcast %16 : vector<256x1xf32> to vector<256x128xf32>
    %18 = arith.mulf %13, %17 : vector<256x128xf32>
    %19 = arith.truncf %18 : vector<256x128xf32> to vector<256x128xbf16>
    %c0_5 = arith.constant 0 : index
    %c0_6 = arith.constant 0 : index
    %20 = vector.load %arg5[%c0_5, %c0_6] : memref<8x128xf32, #tpu.memory_space<vmem>>, vector<8x128xf32>
    %21 = arith.truncf %20 : vector<8x128xf32> to vector<8x128xbf16>
    %c0_7 = arith.constant 0 : index
    %c0_8 = arith.constant 0 : index
    %22 = vector.load %arg2[%c0_7, %c0_8] : memref<128x128xbf16, #tpu.memory_space<vmem>>, vector<128x128xbf16>
    %cst_9 = arith.constant dense<0.000000e+00> : vector<256x128xf32>
    %23 = tpu.matmul %19, %22, %cst_9 {dimension_numbers = #tpu.dot_dimension_numbers<[1], [0], [0], [1], [0, 0, 1, 1], [], []>} : vector<256x128xbf16>, vector<128x128xbf16>, vector<256x128xf32> -> vector<256x128xf32>
    %24 = arith.truncf %23 : vector<256x128xf32> to vector<256x128xbf16>
    %25 = vector.extract_strided_slice %21 {offsets = [0, 0], sizes = [1, 128], strides = [1, 1]} : vector<8x128xbf16> to vector<1x128xbf16>
    %26 = vector.broadcast %25 : vector<1x128xbf16> to vector<256x128xbf16>
    %27 = arith.addf %24, %26 : vector<256x128xbf16>
    %28 = arith.mulf %27, %27 : vector<256x128xbf16>
    %29 = arith.mulf %27, %28 : vector<256x128xbf16>
    %cst_10 = arith.constant 4.467770e-02 : bf16
    %30 = vector.broadcast %cst_10 : bf16 to vector<256x128xbf16>
    %31 = arith.mulf %30, %29 : vector<256x128xbf16>
    %32 = arith.addf %27, %31 : vector<256x128xbf16>
    %cst_11 = arith.constant 7.968750e-01 : bf16
    %33 = vector.broadcast %cst_11 : bf16 to vector<256x128xbf16>
    %34 = arith.mulf %33, %32 : vector<256x128xbf16>
    %35 = math.tanh %34 : vector<256x128xbf16>
    %cst_12 = arith.constant 1.000000e+00 : bf16
    %36 = vector.broadcast %cst_12 : bf16 to vector<256x128xbf16>
    %37 = arith.addf %36, %35 : vector<256x128xbf16>
    %cst_13 = arith.constant 5.000000e-01 : bf16
    %38 = vector.broadcast %cst_13 : bf16 to vector<256x128xbf16>
    %39 = arith.mulf %38, %37 : vector<256x128xbf16>
    %40 = arith.mulf %27, %39 : vector<256x128xbf16>
    %c0_14 = arith.constant 0 : index
    %c0_15 = arith.constant 0 : index
    %41 = vector.load %arg3[%c0_14, %c0_15] : memref<128x128xbf16, #tpu.memory_space<vmem>>, vector<128x128xbf16>
    %cst_16 = arith.constant dense<0.000000e+00> : vector<256x128xf32>
    %42 = tpu.matmul %40, %41, %cst_16 {dimension_numbers = #tpu.dot_dimension_numbers<[1], [0], [0], [1], [0, 0, 1, 1], [], []>} : vector<256x128xbf16>, vector<128x128xbf16>, vector<256x128xf32> -> vector<256x128xf32>
    %43 = arith.truncf %42 : vector<256x128xf32> to vector<256x128xbf16>
    %44 = vector.extract_strided_slice %21 {offsets = [1, 0], sizes = [1, 128], strides = [1, 1]} : vector<8x128xbf16> to vector<1x128xbf16>
    %45 = vector.broadcast %44 : vector<1x128xbf16> to vector<256x128xbf16>
    %46 = arith.addf %43, %45 : vector<256x128xbf16>
    %47 = arith.mulf %46, %46 : vector<256x128xbf16>
    %48 = arith.mulf %46, %47 : vector<256x128xbf16>
    %cst_17 = arith.constant 4.467770e-02 : bf16
    %49 = vector.broadcast %cst_17 : bf16 to vector<256x128xbf16>
    %50 = arith.mulf %49, %48 : vector<256x128xbf16>
    %51 = arith.addf %46, %50 : vector<256x128xbf16>
    %cst_18 = arith.constant 7.968750e-01 : bf16
    %52 = vector.broadcast %cst_18 : bf16 to vector<256x128xbf16>
    %53 = arith.mulf %52, %51 : vector<256x128xbf16>
    %54 = math.tanh %53 : vector<256x128xbf16>
    %cst_19 = arith.constant 1.000000e+00 : bf16
    %55 = vector.broadcast %cst_19 : bf16 to vector<256x128xbf16>
    %56 = arith.addf %55, %54 : vector<256x128xbf16>
    %cst_20 = arith.constant 5.000000e-01 : bf16
    %57 = vector.broadcast %cst_20 : bf16 to vector<256x128xbf16>
    %58 = arith.mulf %57, %56 : vector<256x128xbf16>
    %59 = arith.mulf %46, %58 : vector<256x128xbf16>
    %c0_21 = arith.constant 0 : index
    %c0_22 = arith.constant 0 : index
    %60 = vector.load %arg4[%c0_21, %c0_22] : memref<128x128xbf16, #tpu.memory_space<vmem>>, vector<128x128xbf16>
    %cst_23 = arith.constant dense<0.000000e+00> : vector<256x128xf32>
    %61 = tpu.matmul %59, %60, %cst_23 {dimension_numbers = #tpu.dot_dimension_numbers<[1], [0], [0], [1], [0, 0, 1, 1], [], []>} : vector<256x128xbf16>, vector<128x128xbf16>, vector<256x128xf32> -> vector<256x128xf32>
    %62 = vector.extract_strided_slice %20 {offsets = [2, 0], sizes = [1, 128], strides = [1, 1]} : vector<8x128xf32> to vector<1x128xf32>
    %63 = vector.broadcast %62 : vector<1x128xf32> to vector<256x128xf32>
    %64 = arith.addf %61, %63 : vector<256x128xf32>
    %c0_24 = arith.constant 0 : index
    %c0_25 = arith.constant 0 : index
    %65 = vector.load %arg1[%c0_24, %c0_25] : memref<256x128xf32, #tpu.memory_space<vmem>>, vector<256x128xf32>
    %66 = arith.addf %65, %64 : vector<256x128xf32>
    %c0_26 = arith.constant 0 : index
    %c0_27 = arith.constant 0 : index
    %67 = vector.load %arg6[%c0_26, %c0_27] : memref<256x128xf32, #tpu.memory_space<vmem>>, vector<256x128xf32>
    tpu.vector_store %arg6[%c0_26, %c0_27], %66 {strides = array<i32>} : memref<256x128xf32, #tpu.memory_space<vmem>>, vector<256x128xf32>,
    return
  }
  func.func @transform_0(%arg0: i32) -> (i32, i32) {
    %c0_i32 = arith.constant 0 : i32
    %c0_i32_0 = arith.constant 0 : i32
    return %arg0, %c0_i32 : i32, i32
  }
  func.func @transform_1(%arg0: i32) -> (i32, i32) {
    %c0_i32 = arith.constant 0 : i32
    %c0_i32_0 = arith.constant 0 : i32
    %c0_i32_1 = arith.constant 0 : i32
    return %c0_i32, %c0_i32_0 : i32, i32
  }
  func.func @transform_2(%arg0: i32) -> (i32, i32) {
    %c0_i32 = arith.constant 0 : i32
    %c0_i32_0 = arith.constant 0 : i32
    %c0_i32_1 = arith.constant 0 : i32
    return %c0_i32, %c0_i32_0 : i32, i32
  }
  func.func @transform_3(%arg0: i32) -> (i32, i32) {
    %c0_i32 = arith.constant 0 : i32
    %c0_i32_0 = arith.constant 0 : i32
    %c0_i32_1 = arith.constant 0 : i32
    return %c0_i32, %c0_i32_0 : i32, i32
  }
  func.func @transform_4(%arg0: i32) -> (i32, i32) {
    %c0_i32 = arith.constant 0 : i32
    %c0_i32_0 = arith.constant 0 : i32
    %c0_i32_1 = arith.constant 0 : i32
    return %c0_i32, %c0_i32_0 : i32, i32
  }
  func.func @transform_5(%arg0: i32) -> (i32, i32) {
    %c0_i32 = arith.constant 0 : i32
    %c0_i32_0 = arith.constant 0 : i32
    return %arg0, %c0_i32 : i32, i32
  }
}

</mosaic_0001>

<bundles_post_ra>
// kernel: resblock_pallas.1
= control target key start
LH: loop header
LB: loop body
LE: loop exit
PB: predicated region body
PF: predicated region fallthrough
CT: control target
= control target key end

     0   :  { %10 = vsyncpa [#allocation3], 0  ;;  %s3716_s0 = inlined_call_operand.hbm [shape: f32[2048,128], index: 0, kind: input, shape index: {}]   ;;  %s3717_s1 = inlined_call_operand.hbm [shape: bf16[128,128], index: 1, kind: input, shape index: {}]   ;;  %s3718_s2 = inlined_call_operand.hbm [shape: bf16[128,128], index: 2, kind: input, shape index: {}]   ;;  %s3719_s3 = inlined_call_operand.hbm [shape: bf16[128,128], index: 3, kind: input, shape index: {}]   ;;  %s3720_s4 = inlined_call_operand.hbm [shape: f32[8,128], index: 4, kind: input, shape index: {}]   ;;  %s3721_s5 = inlined_call_operand.hbm [shape: f32[2048,128], index: 5, kind: output, shape index: {}]  }
   0x1   :  { %12 = vsyncpa [#allocation3 + $0x1], 0 }
   0x2   :  { %13 = vsyncpa [#allocation6], 0 }
   0x3   :  { %14 = vsyncpa [#allocation9], 0 }
   0x4   :  { %15 = vsyncpa [#allocation4], 0 }
   0x5   :  { %17 = vsyncpa [#allocation4 + $0x1], 0  ;;  %s2760_s18 = smov 0   ;;  %s2762_s19 = smov 0  }
   0x6   :  { %s2764_s20 = smov 0   ;;  %s2766_s21 = smov 0  }
   0x7 LB: > { %s2781_s22 = sadd.s32 4294967295, %s2716_s21   ;;  %s1943_s23 = sadd.s32 4294967294, %s2716_s21   ;;  %s2716_s21 = sphi %s2766_s21, %s3743_s21   ;;  %s2712_s20 = sphi %s2764_s20, %s3742_s20   ;;  %s2708_s19 = sphi %s2762_s19, %s3741_s19   ;;  %s2704_s18 = sphi %s2760_s18, %s3740_s18  }
   0x8   : > { %p43_p0 = scmp.ne.s32.totalorder %s2708_s19, %s2704_s18  ;;  %p3722_p1 = scmp.eq.s32.totalorder %s2781_s22, 0 }
   0x9   : > { %p157_p3 = scmp.eq.s32.totalorder %s1943_s23, 7  ;;  %p1944_p5 = scmp.ge.s32.totalorder %s2716_s21, 1 }
   0xa   : > { %p2790_p4 = por %p3722_p1, %p43_p0  ;;  %p164_p7 = scmp.lt.s32.totalorder %s2716_s21, 9 }
   0xb   : > { %p2795_p6 = por %p157_p3, %p43_p0  ;;  %s2718_s27 = smov [#allocation5]  }
   0xc   : > { %s3725_s24 = scalar_select %p2790_p4, 1, 0 }
   0xd   : > { %s3726_s25 = scalar_select %p2795_p6, 1, 0 }
   0xe   : > { %p2800_p8 = pnand %p1944_p5, %p164_p7  ;;  %s176_s28 = sshll.u32 %s2718_s27, 4  ;;  %s2804_s28 = int_to_ptr.vmem [resolvable:$true] %s176_s28 }
   0xf   : > { %s2719_s30 = smov [#allocation8]   ;;  %s2720_s7 = smov [#allocation7]  }
  0x10   : > { %s3727_s26 = scalar_select %p2800_p8, 1, 0 }
  0x11   : > { %p2243_p9 = pneg %p2800_p8  ;;  %s202_s6 = sshll.u32 %s2719_s30, 4  ;;  %s2814_s6 = int_to_ptr.vmem [resolvable:$true] %s202_s6 }
  0x12   : > { %s2816_s8 = sshll.u32 %s2720_s7, 4  ;;  %s2500_s11 = scalar_lea.hbm %s3717_s1, 1024  ;;  %s190_s8 = int_to_ptr.vmem [resolvable:$true] %s2816_s8 }
  0x13   : > { %p2810_p10 = pnand %p2243_p9, %p3722_p1  ;;  %p2501_p11 = scmp.ne.s32.totalorder %s3717_s1, %s2500_s11 }
  0x14   : > { %p2507_p3 = scmp.lt.u32.totalorder %s2500_s11, %s3717_s1 }
  0x15   : > { %p2826_p12 = pneg %p2810_p10 }
  0x17   : > { %p2503_p13 = pnand %p2826_p12, %p2501_p11 }
  0x19   : > { %p2504_p0 = pneg %p2503_p13 }
  0x1b   : > { %p2509_p5 = pnand %p2507_p3, %p2504_p0 }
  0x1d   : > { %2512 = shalt.err (!%p2509_p5)
}
  0x1e   : > { %s2513_s17 = scalar_lea.vmem %s2804_s28, 1024  ;;  %p2521_p2 = scmp.lt.s32.totalorder %s2804_s28, %s2804_s28 }
  0x1f   : > { %p2514_p7 = scmp.ne.s32.totalorder %s2804_s28, %s2513_s17  ;;  %p2522_p6 = scmp.lt.s32.totalorder %s2513_s17, %s2513_s17 }
  0x21   : > { %p2516_p9 = pnand %p2514_p7, %p2826_p12  ;;  %p2523_p11 = por %p2522_p6, %p2521_p2 }
  0x23   : > { %p2517_p1 = pneg %p2516_p9 }
  0x25   : > { %p2524_p13 = pnand %p2523_p11, %p2517_p1 }
  0x27   : > { %2527 = shalt.err (!%p2524_p13)
}
  0x28   : > { %s2721_s23 = smov 64   ;;  %s2722_s27 = smov 4  }
  0x29   : > { %2246 = dma.hbm_to_vmem [thread:$0]  (!%p2810_p10), %s3717_s1, 1024, %s2804_s28, [#allocation6], %s2721_s23, %s2721_s23, %s2722_s27  }
  0x2a   : > { %s2528_s11 = scalar_lea.hbm %s3719_s3, 1024 }
  0x2b   : > { %p2529_p1 = scmp.ne.s32.totalorder %s3719_s3, %s2528_s11  ;;  %p2535_p0 = scmp.lt.u32.totalorder %s2528_s11, %s3719_s3 }
  0x2d   : > { %p2531_p2 = pnand %p2529_p1, %p2826_p12 }
  0x2f   : > { %p2532_p6 = pneg %p2531_p2 }
  0x31   : > { %p2537_p3 = pnand %p2535_p0, %p2532_p6 }
  0x33   : > { %2540 = shalt.err (!%p2537_p3)
}
  0x34   : > { %s2541_s28 = scalar_lea.vmem %s2814_s6, 1024  ;;  %p2549_p11 = scmp.lt.s32.totalorder %s2814_s6, %s2814_s6 }
  0x35   : > { %p2542_p5 = scmp.ne.s32.totalorder %s2814_s6, %s2541_s28  ;;  %p2550_p13 = scmp.lt.s32.totalorder %s2541_s28, %s2541_s28 }
  0x37   : > { %p2544_p7 = pnand %p2542_p5, %p2826_p12  ;;  %p2551_p1 = por %p2550_p13, %p2549_p11 }
  0x39   : > { %p2545_p9 = pneg %p2544_p7 }
  0x3b   : > { %p2552_p2 = pnand %p2551_p1, %p2545_p9 }
  0x3d   : > { %2555 = shalt.err (!%p2552_p2)
}
  0x3e   : > { %2252 = dma.hbm_to_vmem [thread:$0]  (!%p2810_p10), %s3719_s3, 1024, %s2814_s6, [#allocation9], %s2721_s23, %s2721_s23, %s2722_s27  }
  0x3f   : > { %s2556_s10 = scalar_lea.hbm %s3718_s2, 1024 }
  0x40   : > { %p2557_p6 = scmp.ne.s32.totalorder %s3718_s2, %s2556_s10  ;;  %p2563_p5 = scmp.lt.u32.totalorder %s2556_s10, %s3718_s2 }
  0x42   : > { %p2559_p0 = pnand %p2557_p6, %p2826_p12 }
  0x44   : > { %p2560_p3 = pneg %p2559_p0 }
  0x46   : > { %p2565_p7 = pnand %p2563_p5, %p2560_p3 }
  0x48   : > { %2568 = shalt.err (!%p2565_p7)
}
  0x49   : > { %s2569_s16 = scalar_lea.vmem %s190_s8, 1024  ;;  %p2577_p1 = scmp.lt.s32.totalorder %s190_s8, %s190_s8 }
  0x4a   : > { %p2570_p9 = scmp.ne.s32.totalorder %s190_s8, %s2569_s16  ;;  %p2578_p2 = scmp.lt.s32.totalorder %s2569_s16, %s2569_s16 }
  0x4c   : > { %p2572_p11 = pnand %p2570_p9, %p2826_p12  ;;  %p2579_p4 = por %p2578_p2, %p2577_p1 }
  0x4e   : > { %p2573_p13 = pneg %p2572_p11 }
  0x50   : > { %p2580_p8 = pnand %p2579_p4, %p2573_p13 }
  0x52   : > { %2583 = shalt.err (!%p2580_p8)
}
  0x53   : > { %2249 = dma.hbm_to_vmem [thread:$0]  (!%p2810_p10), %s3718_s2, 1024, %s190_s8, [#allocation6], %s2721_s23, %s2721_s23, %s2722_s27  }
  0x54   : > { %s2723_s17 = smov [#allocation10]   ;;  %s2584_s10 = scalar_lea.hbm %s3720_s4, 128 }
  0x55   : > { %s216_s30 = sshll.u32 %s2723_s17, 4  ;;  %p2585_p4 = scmp.ne.s32.totalorder %s3720_s4, %s2584_s10  ;;  %s217_s30 = int_to_ptr.vmem [resolvable:$true] %s216_s30 }
  0x56   : > { %p2591_p0 = scmp.lt.u32.totalorder %s2584_s10, %s3720_s4 }
  0x57   : > { %p2587_p8 = pnand %p2585_p4, %p2826_p12 }
  0x59   : > { %p2588_p6 = pneg %p2587_p8 }
  0x5b   : > { %p2593_p3 = pnand %p2591_p0, %p2588_p6 }
  0x5d   : > { %2596 = shalt.err (!%p2593_p3)
}
  0x5e   : > { %s2597_s8 = scalar_lea.vmem %s217_s30, 128  ;;  %p2605_p11 = scmp.lt.s32.totalorder %s217_s30, %s217_s30 }
  0x5f   : > { %p2598_p5 = scmp.ne.s32.totalorder %s217_s30, %s2597_s8  ;;  %p2606_p13 = scmp.lt.s32.totalorder %s2597_s8, %s2597_s8 }
  0x61   : > { %p2600_p7 = pnand %p2598_p5, %p2826_p12  ;;  %p2607_p1 = por %p2606_p13, %p2605_p11 }
  0x63   : > { %p2601_p9 = pneg %p2600_p7 }
  0x65   : > { %p2608_p2 = pnand %p2607_p1, %p2601_p9 }
  0x67   : > { %2611 = shalt.err (!%p2608_p2)
}
  0x68   : > { %2255 = dma.hbm_to_vmem [thread:$0]  (!%p2810_p10), %s3720_s4, 128, %s217_s30, [#allocation9]  }
  0x69   : > { %s2917_s14 = sadd.s32 1, %s2716_s21   ;;  %s30_s16 = sadd.s32 1, %s2712_s20 }
  0x6a   : > { %s27_s29 = ssub.s32 %s2716_s21, %s2917_s14  ;;  %p37_p12 = scmp.ne.s32.totalorder %s2712_s20, %s2708_s19 }
  0x6b   : > { %p28_p4 = scmp.eq.s32.totalorder %s27_s29, 0  ;;  %p38_p8 = scmp.eq.s32.totalorder %s2716_s21, 0 }
  0x6c   : > { %p3730_p6 = scmp.eq.s32.totalorder %s2781_s22, 7  ;;  %p2268_p3 = scmp.lt.s32.totalorder %s2716_s21, 8 }
  0x6d   : > { %s2933_s28 = scalar_select %p28_p4, %s2712_s20, %s30_s16  }
  0x6e   : > { %p2927_p0 = por %p3730_p6, %p37_p12  ;;  %p39_p5 = por %p38_p8, %p37_p12 }
  0x6f   : > { %s227_s17 = sand.u32 1, %s2712_s20   ;;  %s1989_s30 = sshll.u32 %s2716_s21, 12 }
  0x70   : > { %s1950_s7 = sshll.u32 %s227_s17, 8  ;;  %s2940_s11 = scalar_lea.hbm %s3716_s0, %s1989_s30 }
  0x71   : > { %s231_s12 = scalar_lea.vmem [#allocation2], %s1950_s7  ;;  %p2944_p10 = pnand %p2268_p3, %p39_p5 }
  0x72   : > { %s238_s13 = sshll.u32 %s231_s12, 4  ;;  %s2948_s8 = scalar_lea.sflag [#allocation3], %s227_s17  ;;  %s2942_s13 = int_to_ptr.vmem [resolvable:$true] %s238_s13 }
  0x73   : > { %s2612_s23 = scalar_lea.hbm %s2940_s11, 4096  ;;  %p2614_p9 = pneg %p2944_p10 }
  0x74   : > { %p2613_p7 = scmp.ne.s32.totalorder %s2940_s11, %s2612_s23  ;;  %s2617_s29 = scalar_lea.hbm %s3716_s0, 32768 }
  0x75   : > { %p2618_p1 = scmp.lt.u32.totalorder %s2940_s11, %s3716_s0  ;;  %p2619_p2 = scmp.lt.u32.totalorder %s2617_s29, %s2612_s23 }
  0x76   : > { %p2615_p11 = pnand %p2614_p9, %p2613_p7  ;;  %p2621_p4 = scmp.lt.u32.totalorder %s2612_s23, %s2940_s11 }
  0x77   : > { %p2620_p12 = por %p2619_p2, %p2618_p1 }
  0x78   : > { %p2616_p13 = pneg %p2615_p11 }
  0x79   : > { %p2622_p8 = por %p2621_p4, %p2620_p12 }
  0x7b   : > { %p2623_p6 = pnand %p2622_p8, %p2616_p13 }
  0x7d   : > { %2626 = shalt.err (!%p2623_p6)
}
  0x7e   : > { %s2627_s17 = scalar_lea.vmem %s2942_s13, 4096  ;;  %s2724_s9 = smov [#allocation2]  }
  0x7f   : > { %p2628_p3 = scmp.ne.s32.totalorder %s2942_s13, %s2627_s17  ;;  %s2632_s10 = sshll.u32 %s2724_s9, 4  ;;  %s2633_s10 = int_to_ptr.vmem [resolvable:$false] %s2632_s10 }
  0x80   : > { %s2634_s12 = scalar_lea.vmem %s2633_s10, 8192  ;;  %p2635_p11 = scmp.lt.s32.totalorder %s2942_s13, %s2633_s10 }
  0x81   : > { %p2630_p5 = pnand %p2628_p3, %p2614_p9  ;;  %p2636_p1 = scmp.lt.s32.totalorder %s2634_s12, %s2627_s17 }
  0x83   : > { %p2631_p7 = pneg %p2630_p5  ;;  %p2637_p2 = por %p2636_p1, %p2635_p11 }
  0x85   : > { %p2638_p12 = pnand %p2637_p2, %p2631_p7 }
  0x87   : > { %2641 = shalt.err (!%p2638_p12)
}
  0x88   : > { %s2725_s23 = smov 128   ;;  %s2726_s27 = smov 8  }
  0x89   : > { %2259 = dma.hbm_to_vmem [thread:$0]  (!%p2944_p10), %s2940_s11, 4096, %s2942_s13, %s2948_s8, %s2725_s23, %s2725_s23, %s2726_s27  }
  0x8a   : > { %p3733_p9 = scmp.ne.s32.totalorder %s3727_s26, 0 }
  0x8b   : > { %s2979_s16 = sand.u32 (!%p3733_p9), 1, %s2708_s19   ;;  %p3734_p13 = scmp.ne.s32.totalorder (!%p3733_p9), %s3725_s24, 0 }
  0x8c   : > { %250 = sbr.rel (%p3733_p9) target bundleno = 1259 (0x4eb), region = 40  ;;  %s1954_s29 = sshll.u32 (!%p3733_p9), %s2979_s16, 8 }
  0x8d   : > { %s253_s7 = scalar_lea.sflag (!%p3733_p9), [#allocation3], %s2979_s16  ;;  %s2985_s30 = scalar_lea.vmem (!%p3733_p9), [#allocation2], %s1954_s29 }
  0x93   : > { %2687 = dma.done.wait (%p3734_p13), %s253_s7, 4096  }
  0x94   : > { %2689 = vsyncadd (%p3734_p13), %s253_s7, 4294963200  ;;  %p3735_p10 = scmp.eq.s32.totalorder %s2781_s22, 0 }
  0x96   : > { %2691 = dma.done.wait (%p3735_p10), [#allocation6], 2048   ;;  %p3736_p4 = pmov %p3735_p10 }
  0x98   : > { %2693 = vsyncadd (%p3736_p4), [#allocation6], 4294965248  ;;  %p3737_p8 = pmov %p3736_p4 }
  0x99   : > { %p3738_p6 = pmov %p3736_p4 }
  0x9a   : > { %2695 = dma.done.wait (%p3737_p8), [#allocation9], 1152  }
  0x9b   : > { %2697 = vsyncadd (%p3738_p6), [#allocation9], 4294966144  ;;  %v3000_v0 = vld [vmem:[%s2985_s30] sm:$0xff]  ;;  %v3003_v1 = vld [vmem:[%s2985_s30 + $0x10] sm:$0xff]  ;;  %s3574_s24 = scalar_lea.vmem [#allocation11], %s1954_s29  ;;  %s1990_s26 = sshll.u32 %s2781_s22, 12 }
  0x9c   : > { %338 = vadd.xlane.f32.xlu0 %v3000_v0  ;;  %342 = vadd.xlane.f32.xlu1 %v3003_v1  ;;  %v3008_v2 = vld [vmem:[%s2985_s30 + $0x8] sm:$0xff]  ;;  %v3011_v3 = vld [vmem:[%s2985_s30 + $0x18] sm:$0xff]  ;;  %v3016_v4 = vld [vmem:[%s2985_s30 + $0x20] sm:$0xff]  ;;  %s1832_s11 = sshll.u32 %s3574_s24, 4  ;;  %s3667_s22 = scalar_lea.hbm %s3721_s5, %s1990_s26  ;;  %s3669_s11 = int_to_ptr.vmem [resolvable:$true] %s1832_s11 }
  0x9d   : > { %v3019_v5 = vld [vmem:[%s2985_s30 + $0x28] sm:$0xff]  ;;  %v3024_v6 = vld [vmem:[%s2985_s30 + $0x30] sm:$0xff]  ;;  %v3027_v7 = vld [vmem:[%s2985_s30 + $0x38] sm:$0xff]  ;;  %s1819_s8 = scalar_lea.sflag [#allocation4], %s2979_s16  ;;  %s2642_s17 = scalar_lea.vmem %s3669_s11, 4096 }
  0x9e   : > { %v3030_v8 = vld [vmem:[%s2985_s30 + $0x40] sm:$0xff]  ;;  %v3033_v9 = vld [vmem:[%s2985_s30 + $0x48] sm:$0xff]  ;;  %v3038_v10 = vld [vmem:[%s2985_s30 + $0x50] sm:$0xff]  ;;  %p2643_p3 = scmp.ne.s32.totalorder %s3669_s11, %s2642_s17  ;;  %s2727_s9 = smov [#allocation11]  }
  0x9f   : > { %v3041_v11 = vld [vmem:[%s2985_s30 + $0x58] sm:$0xff]  ;;  %v3046_v12 = vld [vmem:[%s2985_s30 + $0x60] sm:$0xff]  ;;  %v3049_v13 = vld [vmem:[%s2985_s30 + $0x68] sm:$0xff]  ;;  %s2646_s10 = sshll.u32 %s2727_s9, 4  ;;  %s2647_s10 = int_to_ptr.vmem [resolvable:$false] %s2646_s10 }
  0xa0   : > { %340 = vadd.xlane.f32.xlu0 %v3008_v2  ;;  %344 = vadd.xlane.f32.xlu1 %v3011_v3  ;;  %v3054_v14 = vld [vmem:[%s2985_s30 + $0x70] sm:$0xff]  ;;  %v3059_v15 = vld [vmem:[%s2985_s30 + $0x78] sm:$0xff]  ;;  %v3064_v16 = vld [vmem:[%s2985_s30 + $0x80] sm:$0xff]  ;;  %p2644_p5 = pnand %p2643_p3, %p2927_p0  ;;  %s2648_s12 = scalar_lea.vmem %s2647_s10, 8192 }
  0xa1   : > { %v3067_v17 = vld [vmem:[%s2985_s30 + $0x88] sm:$0xff]  ;;  %v3072_v18 = vld [vmem:[%s2985_s30 + $0x90] sm:$0xff]  ;;  %v3075_v19 = vld [vmem:[%s2985_s30 + $0x98] sm:$0xff]  ;;  %p2649_p11 = scmp.lt.s32.totalorder %s3669_s11, %s2647_s10  ;;  %p2650_p1 = scmp.lt.s32.totalorder %s2648_s12, %s2642_s17 }
  0xa2   : > { %v3080_v20 = vld [vmem:[%s2985_s30 + $0xa0] sm:$0xff]  ;;  %v3083_v21 = vld [vmem:[%s2985_s30 + $0xa8] sm:$0xff]  ;;  %v3088_v22 = vld [vmem:[%s2985_s30 + $0xb0] sm:$0xff]  ;;  %p2645_p7 = pneg %p2644_p5 }
  0xa3   : > { %v3091_v23 = vld [vmem:[%s2985_s30 + $0xb8] sm:$0xff]  ;;  %v3096_v24 = vld [vmem:[%s2985_s30 + $0xc0] sm:$0xff]  ;;  %v3099_v25 = vld [vmem:[%s2985_s30 + $0xc8] sm:$0xff]  ;;  %p2651_p2 = por %p2650_p1, %p2649_p11 }
  0xa4   : > { %346 = vadd.xlane.f32.xlu0 %v3016_v4  ;;  %348 = vadd.xlane.f32.xlu1 %v3019_v5  ;;  %v3104_v26 = vld [vmem:[%s2985_s30 + $0xd0] sm:$0xff]  ;;  %v3107_v27 = vld [vmem:[%s2985_s30 + $0xd8] sm:$0xff]  ;;  %v3112_v28 = vld [vmem:[%s2985_s30 + $0xe0] sm:$0xff] }
  0xa5   : > { %v3115_v29 = vld [vmem:[%s2985_s30 + $0xe8] sm:$0xff]  ;;  %v3120_v30 = vld [vmem:[%s2985_s30 + $0xf0] sm:$0xff]  ;;  %v3123_v31 = vld [vmem:[%s2985_s30 + $0xf8] sm:$0xff]  ;;  %p2652_p12 = pnand %p2651_p2, %p2645_p7 }
  0xa6   : > { %v2316_v32 = vld [vmem:[#allocation5] sm:$0xff]   ;;  %v2317_v33 = vld [vmem:[#allocation5 + $0x8] sm:$0xff]  }
  0xa7   : > { %2063 = vmatprep.subr.bf16.mxu0 %v2316_v32  ;;  %2207 = vmatprep.subr.bf16.mxu1 %v2316_v32 }
  0xa8   : > { %350 = vadd.xlane.f32.xlu0 %v3024_v6  ;;  %352 = vadd.xlane.f32.xlu1 %v3027_v7 }
  0xa9   : > { %2064 = vmatpush3.bf16.msra.mxu0 %v2316_v32  ;;  %2215 = vmatpush3.bf16.msra.mxu1 %v2316_v32 }
  0xaa   : > { %2065 = vmatprep.subr.bf16.mxu0 %v2317_v33  ;;  %2208 = vmatprep.subr.bf16.mxu1 %v2317_v33 }
  0xac   : > { %354 = vadd.xlane.f32.xlu0 %v3030_v8  ;;  %356 = vadd.xlane.f32.xlu1 %v3033_v9 }
  0xad   : > { %2066 = vmatpush3.bf16.msra.mxu0 %v2317_v33  ;;  %2216 = vmatpush3.bf16.msra.mxu1 %v2317_v33 }
  0xb0   : > { %358 = vadd.xlane.f32.xlu0 %v3038_v10  ;;  %360 = vadd.xlane.f32.xlu1 %v3041_v11 }
  0xb4   : > { %362 = vadd.xlane.f32.xlu0 %v3046_v12  ;;  %364 = vadd.xlane.f32.xlu1 %v3049_v13 }
  0xb8   : > { %366 = vadd.xlane.f32.xlu0 %v3054_v14  ;;  %368 = vadd.xlane.f32.xlu1 %v3059_v15 }
  0xbc   : > { %370 = vadd.xlane.f32.xlu0 %v3064_v16  ;;  %372 = vadd.xlane.f32.xlu1 %v3067_v17 }
  0xc0   : > { %374 = vadd.xlane.f32.xlu0 %v3072_v18  ;;  %376 = vadd.xlane.f32.xlu1 %v3075_v19 }
  0xc4   : > { %378 = vadd.xlane.f32.xlu0 %v3080_v20  ;;  %380 = vadd.xlane.f32.xlu1 %v3083_v21 }
  0xc8   : > { %382 = vadd.xlane.f32.xlu0 %v3088_v22  ;;  %384 = vadd.xlane.f32.xlu1 %v3091_v23 }
  0xcc   : > { %386 = vadd.xlane.f32.xlu0 %v3096_v24  ;;  %388 = vadd.xlane.f32.xlu1 %v3099_v25 }
  0xd0   : > { %390 = vadd.xlane.f32.xlu0 %v3104_v26  ;;  %392 = vadd.xlane.f32.xlu1 %v3107_v27 }
  0xd4   : > { %394 = vadd.xlane.f32.xlu0 %v3112_v28  ;;  %396 = vadd.xlane.f32.xlu1 %v3115_v29 }
  0xd8   : > { %398 = vadd.xlane.f32.xlu0 %v3120_v30  ;;  %400 = vadd.xlane.f32.xlu1 %v3123_v31 }
 0x129   : > { %v339_v34 = vpop.xlane.xlu0 %338  ;;  %v343_v35 = vpop.xlane.xlu1 %342 }
 0x12a   : > { %v403_v36 = vmul.f32 0.0078125, %v339_v34  ;;  %v405_v37 = vmul.f32 0.0078125, %v343_v35 }
 0x12c   : > { %v3128_v38 = vsub.f32 %v3000_v0, %v403_v36  ;;  %v3131_v39 = vsub.f32 %v3003_v1, %v405_v37  ;;  %v2318_v37 = vld [vmem:[#allocation5 + $0x10] sm:$0xff]  }
 0x12d   : > { %v341_v40 = vpop.xlane.xlu0 %340  ;;  %v345_v41 = vpop.xlane.xlu1 %344  ;;  %2067 = vmatprep.subr.bf16.mxu0 %v2318_v37  ;;  %2209 = vmatprep.subr.bf16.mxu1 %v2318_v37 }
 0x12e   : > { %v404_v42 = vmul.f32 0.0078125, %v341_v40  ;;  %v467_v43 = vmul.f32 %v3128_v38, %v3128_v38  ;;  %v406_v44 = vmul.f32 0.0078125, %v345_v41  ;;  %v469_v47 = vmul.f32 %v3131_v39, %v3131_v39  ;;  %2068 = vmatpush3.bf16.msra.mxu0 %v2318_v37  ;;  %2217 = vmatpush3.bf16.msra.mxu1 %v2318_v37 }
 0x130   : > { %v3136_v45 = vsub.f32 %v3008_v2, %v404_v42  ;;  %499 = vadd.xlane.f32.xlu0 %v467_v43  ;;  %v3139_v46 = vsub.f32 %v3011_v3, %v406_v44 }
 0x131   : > { %v347_v48 = vpop.xlane.xlu0 %346  ;;  %v349_v49 = vpop.xlane.xlu1 %348 }
 0x132   : > { %v407_v50 = vmul.f32 0.0078125, %v347_v48  ;;  %v468_v51 = vmul.f32 %v3136_v45, %v3136_v45  ;;  %v408_v52 = vmul.f32 0.0078125, %v349_v49  ;;  %v470_v55 = vmul.f32 %v3139_v46, %v3139_v46  ;;  %v2319_v49 = vld [vmem:[#allocation5 + $0x18] sm:$0xff]  }
 0x133   : > { %2069 = vmatprep.subr.bf16.mxu0 %v2319_v49  ;;  %2210 = vmatprep.subr.bf16.mxu1 %v2319_v49 }
 0x134   : > { %v3146_v53 = vsub.f32 %v3016_v4, %v407_v50  ;;  %503 = vadd.xlane.f32.xlu0 %v469_v47  ;;  %501 = vadd.xlane.f32.xlu1 %v468_v51  ;;  %v3149_v54 = vsub.f32 %v3019_v5, %v408_v52 }
 0x135   : > { %v351_v56 = vpop.xlane.xlu0 %350  ;;  %v353_v57 = vpop.xlane.xlu1 %352  ;;  %2070 = vmatpush3.bf16.msra.mxu0 %v2319_v49  ;;  %2218 = vmatpush3.bf16.msra.mxu1 %v2319_v49 }
 0x136   : > { %v409_v58 = vmul.f32 0.0078125, %v351_v56  ;;  %v471_v59 = vmul.f32 %v3146_v53, %v3146_v53  ;;  %v410_v60 = vmul.f32 0.0078125, %v353_v57  ;;  %v472_v63 = vmul.f32 %v3149_v54, %v3149_v54 }
 0x138   : > { %v3156_v61 = vsub.f32 %v3024_v6, %v409_v58  ;;  %505 = vadd.xlane.f32.xlu1 %v470_v55  ;;  %507 = vadd.xlane.f32.xlu0 %v471_v59  ;;  %v3159_v62 = vsub.f32 %v3027_v7, %v410_v60  ;;  %v2320_v58 = vld [vmem:[#allocation5 + $0x20] sm:$0xff]  }
 0x139   : > { %v355_v0 = vpop.xlane.xlu0 %354  ;;  %v357_v1 = vpop.xlane.xlu1 %356  ;;  %2071 = vmatprep.subr.bf16.mxu0 %v2320_v58  ;;  %2211 = vmatprep.subr.bf16.mxu1 %v2320_v58 }
 0x13a   : > { %v411_v2 = vmul.f32 0.0078125, %v355_v0  ;;  %v473_v3 = vmul.f32 %v3156_v61, %v3156_v61  ;;  %v412_v4 = vmul.f32 0.0078125, %v357_v1  ;;  %v474_v7 = vmul.f32 %v3159_v62, %v3159_v62  ;;  %2072 = vmatpush3.bf16.msra.mxu0 %v2320_v58  ;;  %2219 = vmatpush3.bf16.msra.mxu1 %v2320_v58 }
 0x13c   : > { %v3166_v5 = vsub.f32 %v3030_v8, %v411_v2  ;;  %509 = vadd.xlane.f32.xlu1 %v472_v63  ;;  %511 = vadd.xlane.f32.xlu0 %v473_v3  ;;  %v3169_v6 = vsub.f32 %v3033_v9, %v412_v4  ;;  %v2321_v3 = vld [vmem:[#allocation5 + $0x28] sm:$0xff]  }
 0x13d   : > { %v359_v32 = vpop.xlane.xlu0 %358  ;;  %v361_v33 = vpop.xlane.xlu1 %360  ;;  %2073 = vmatprep.subr.bf16.mxu0 %v2321_v3  ;;  %2212 = vmatprep.subr.bf16.mxu1 %v2321_v3 }
 0x13e   : > { %v413_v34 = vmul.f32 0.0078125, %v359_v32  ;;  %v475_v35 = vmul.f32 %v3166_v5, %v3166_v5  ;;  %v414_v36 = vmul.f32 0.0078125, %v361_v33  ;;  %v476_v9 = vmul.f32 %v3169_v6, %v3169_v6  ;;  %2074 = vmatpush3.bf16.msra.mxu0 %v2321_v3  ;;  %2220 = vmatpush3.bf16.msra.mxu1 %v2321_v3 }
 0x140   : > { %v3176_v40 = vsub.f32 %v3038_v10, %v413_v34  ;;  %513 = vadd.xlane.f32.xlu1 %v474_v7  ;;  %515 = vadd.xlane.f32.xlu0 %v475_v35  ;;  %v3179_v8 = vsub.f32 %v3041_v11, %v414_v36  ;;  %v2322_v36 = vld [vmem:[#allocation5 + $0x30] sm:$0xff]  }
 0x141   : > { %v363_v41 = vpop.xlane.xlu0 %362  ;;  %v365_v42 = vpop.xlane.xlu1 %364  ;;  %2075 = vmatprep.subr.bf16.mxu0 %v2322_v36  ;;  %2213 = vmatprep.subr.bf16.mxu1 %v2322_v36 }
 0x142   : > { %v415_v43 = vmul.f32 0.0078125, %v363_v41  ;;  %v477_v44 = vmul.f32 %v3176_v40, %v3176_v40  ;;  %v416_v47 = vmul.f32 0.0078125, %v365_v42  ;;  %v478_v48 = vmul.f32 %v3179_v8, %v3179_v8  ;;  %2076 = vmatpush3.bf16.msra.mxu0 %v2322_v36  ;;  %2221 = vmatpush3.bf16.msra.mxu1 %v2322_v36 }
 0x144   : > { %v3186_v10 = vsub.f32 %v3046_v12, %v415_v43  ;;  %517 = vadd.xlane.f32.xlu1 %v476_v9  ;;  %519 = vadd.xlane.f32.xlu0 %v477_v44  ;;  %v3189_v11 = vsub.f32 %v3049_v13, %v416_v47  ;;  %v2323_v47 = vld [vmem:[#allocation5 + $0x38] sm:$0xff]  }
 0x145   : > { %v367_v50 = vpop.xlane.xlu0 %366  ;;  %v369_v51 = vpop.xlane.xlu1 %368  ;;  %2077 = vmatprep.subr.bf16.mxu0 %v2323_v47  ;;  %2214 = vmatprep.subr.bf16.mxu1 %v2323_v47 }
 0x146   : > { %v417_v52 = vmul.f32 0.0078125, %v367_v50  ;;  %v479_v55 = vmul.f32 %v3186_v10, %v3186_v10  ;;  %v418_v56 = vmul.f32 0.0078125, %v369_v51  ;;  %v480_v57 = vmul.f32 %v3189_v11, %v3189_v11  ;;  %2078 = vmatpush3.bf16.msra.mxu0 %v2323_v47  ;;  %2222 = vmatpush3.bf16.msra.mxu1 %v2323_v47 }
 0x148   : > { %v3196_v12 = vsub.f32 %v3054_v14, %v417_v52  ;;  %521 = vadd.xlane.f32.xlu1 %v478_v48  ;;  %523 = vadd.xlane.f32.xlu0 %v479_v55  ;;  %v3199_v13 = vsub.f32 %v3059_v15, %v418_v56 }
 0x149   : > { %v371_v59 = vpop.xlane.xlu0 %370  ;;  %v373_v60 = vpop.xlane.xlu1 %372 }
 0x14a   : > { %v419_v63 = vmul.f32 0.0078125, %v371_v59  ;;  %v481_v0 = vmul.f32 %v3196_v12, %v3196_v12  ;;  %v420_v1 = vmul.f32 0.0078125, %v373_v60  ;;  %v482_v2 = vmul.f32 %v3199_v13, %v3199_v13 }
 0x14c   : > { %v3206_v14 = vsub.f32 %v3064_v16, %v419_v63  ;;  %525 = vadd.xlane.f32.xlu1 %v480_v57  ;;  %527 = vadd.xlane.f32.xlu0 %v481_v0  ;;  %v3209_v15 = vsub.f32 %v3067_v17, %v420_v1 }
 0x14d   : > { %v375_v4 = vpop.xlane.xlu0 %374  ;;  %v377_v7 = vpop.xlane.xlu1 %376 }
 0x14e   : > { %v421_v32 = vmul.f32 0.0078125, %v375_v4  ;;  %v483_v33 = vmul.f32 %v3206_v14, %v3206_v14  ;;  %v422_v34 = vmul.f32 0.0078125, %v377_v7  ;;  %v484_v35 = vmul.f32 %v3209_v15, %v3209_v15 }
 0x150   : > { %v3216_v16 = vsub.f32 %v3072_v18, %v421_v32  ;;  %529 = vadd.xlane.f32.xlu1 %v482_v2  ;;  %531 = vadd.xlane.f32.xlu0 %v483_v33  ;;  %v3219_v17 = vsub.f32 %v3075_v19, %v422_v34 }
 0x151   : > { %v379_v37 = vpop.xlane.xlu0 %378  ;;  %v381_v9 = vpop.xlane.xlu1 %380 }
 0x152   : > { %v423_v41 = vmul.f32 0.0078125, %v379_v37  ;;  %v485_v42 = vmul.f32 %v3216_v16, %v3216_v16  ;;  %v424_v43 = vmul.f32 0.0078125, %v381_v9  ;;  %v486_v44 = vmul.f32 %v3219_v17, %v3219_v17 }
 0x154   : > { %v3226_v18 = vsub.f32 %v3080_v20, %v423_v41  ;;  %533 = vadd.xlane.f32.xlu1 %v484_v35  ;;  %535 = vadd.xlane.f32.xlu0 %v485_v42  ;;  %v3229_v19 = vsub.f32 %v3083_v21, %v424_v43 }
 0x155   : > { %v383_v48 = vpop.xlane.xlu0 %382  ;;  %v385_v49 = vpop.xlane.xlu1 %384 }
 0x156   : > { %v425_v50 = vmul.f32 0.0078125, %v383_v48  ;;  %v487_v51 = vmul.f32 %v3226_v18, %v3226_v18  ;;  %v426_v52 = vmul.f32 0.0078125, %v385_v49  ;;  %v488_v55 = vmul.f32 %v3229_v19, %v3229_v19 }
 0x158   : > { %v3236_v20 = vsub.f32 %v3088_v22, %v425_v50  ;;  %537 = vadd.xlane.f32.xlu1 %v486_v44  ;;  %539 = vadd.xlane.f32.xlu0 %v487_v51  ;;  %v3239_v21 = vsub.f32 %v3091_v23, %v426_v52 }
 0x159   : > { %v387_v56 = vpop.xlane.xlu0 %386  ;;  %v389_v57 = vpop.xlane.xlu1 %388 }
 0x15a   : > { %v427_v58 = vmul.f32 0.0078125, %v387_v56  ;;  %v489_v59 = vmul.f32 %v3236_v20, %v3236_v20  ;;  %v428_v60 = vmul.f32 0.0078125, %v389_v57  ;;  %v490_v23 = vmul.f32 %v3239_v21, %v3239_v21 }
 0x15c   : > { %v3246_v63 = vsub.f32 %v3096_v24, %v427_v58  ;;  %541 = vadd.xlane.f32.xlu1 %v488_v55  ;;  %543 = vadd.xlane.f32.xlu0 %v489_v59  ;;  %v3249_v22 = vsub.f32 %v3099_v25, %v428_v60 }
 0x15d   : > { %v391_v0 = vpop.xlane.xlu0 %390  ;;  %v393_v1 = vpop.xlane.xlu1 %392 }
 0x15e   : > { %v429_v2 = vmul.f32 0.0078125, %v391_v0  ;;  %v491_v3 = vmul.f32 %v3246_v63, %v3246_v63  ;;  %v430_v4 = vmul.f32 0.0078125, %v393_v1  ;;  %v492_v25 = vmul.f32 %v3249_v22, %v3249_v22 }
 0x160   : > { %v3256_v7 = vsub.f32 %v3104_v26, %v429_v2  ;;  %545 = vadd.xlane.f32.xlu1 %v490_v23  ;;  %547 = vadd.xlane.f32.xlu0 %v491_v3  ;;  %v3259_v24 = vsub.f32 %v3107_v27, %v430_v4 }
 0x161   : > { %v395_v32 = vpop.xlane.xlu0 %394  ;;  %v397_v33 = vpop.xlane.xlu1 %396 }
 0x162   : > { %v431_v34 = vmul.f32 0.0078125, %v395_v32  ;;  %v493_v35 = vmul.f32 %v3256_v7, %v3256_v7  ;;  %v432_v36 = vmul.f32 0.0078125, %v397_v33  ;;  %v494_v27 = vmul.f32 %v3259_v24, %v3259_v24 }
 0x164   : > { %v3266_v37 = vsub.f32 %v3112_v28, %v431_v34  ;;  %549 = vadd.xlane.f32.xlu1 %v492_v25  ;;  %551 = vadd.xlane.f32.xlu0 %v493_v35  ;;  %v3269_v26 = vsub.f32 %v3115_v29, %v432_v36 }
 0x165   : > { %v399_v9 = vpop.xlane.xlu0 %398  ;;  %v401_v41 = vpop.xlane.xlu1 %400 }
 0x166   : > { %v433_v42 = vmul.f32 0.0078125, %v399_v9  ;;  %v495_v43 = vmul.f32 %v3266_v37, %v3266_v37  ;;  %v434_v44 = vmul.f32 0.0078125, %v401_v41  ;;  %v496_v29 = vmul.f32 %v3269_v26, %v3269_v26 }
 0x168   : > { %v3276_v47 = vsub.f32 %v3120_v30, %v433_v42  ;;  %553 = vadd.xlane.f32.xlu1 %v494_v27  ;;  %555 = vadd.xlane.f32.xlu0 %v495_v43  ;;  %v3279_v28 = vsub.f32 %v3123_v31, %v434_v44 }
 0x16a   : > { %v497_v48 = vmul.f32 %v3276_v47, %v3276_v47  ;;  %v498_v49 = vmul.f32 %v3279_v28, %v3279_v28 }
 0x16c   : > { %557 = vadd.xlane.f32.xlu1 %v496_v29  ;;  %559 = vadd.xlane.f32.xlu0 %v497_v48 }
 0x170   : > { %561 = vadd.xlane.f32.xlu1 %v498_v49 }
 0x1bd   : > { %v500_v50 = vpop.xlane.xlu0 %499 }
 0x1be   : > { %v563_v30 = vmul.f32 0.0078125, %v500_v50 }
 0x1c0   : > { %v595_v51 = vadd.f32 1e-05, %v563_v30 }
 0x1c1   : > { %v502_v52 = vpop.xlane.xlu1 %501  ;;  %v504_v55 = vpop.xlane.xlu0 %503 }
 0x1c2   : > { %v564_v56 = vmul.f32 0.0078125, %v502_v52  ;;  %v565_v31 = vmul.f32 0.0078125, %v504_v55  ;;  %2340 = vrsqrt.f32 %v595_v51 }
 0x1c4   : > { %v596_v57 = vadd.f32 1e-05, %v564_v56  ;;  %v597_v58 = vadd.f32 1e-05, %v565_v31 }
 0x1c5   : > { %v506_v59 = vpop.xlane.xlu1 %505  ;;  %v508_v60 = vpop.xlane.xlu0 %507 }
 0x1c6   : > { %2342 = vrsqrt.f32 %v596_v57  ;;  %v566_v23 = vmul.f32 0.0078125, %v506_v59  ;;  %v567_v0 = vmul.f32 0.0078125, %v508_v60 }
 0x1c7   : > { %2344 = vrsqrt.f32 %v597_v58 }
 0x1c8   : > { %v598_v1 = vadd.f32 1e-05, %v566_v23  ;;  %v599_v2 = vadd.f32 1e-05, %v567_v0 }
 0x1c9   : > { %v510_v3 = vpop.xlane.xlu1 %509  ;;  %v512_v4 = vpop.xlane.xlu0 %511 }
 0x1ca   : > { %2346 = vrsqrt.f32 %v598_v1  ;;  %v568_v25 = vmul.f32 0.0078125, %v510_v3  ;;  %v569_v32 = vmul.f32 0.0078125, %v512_v4 }
 0x1cb   : > { %2348 = vrsqrt.f32 %v599_v2 }
 0x1cc   : > { %v600_v33 = vadd.f32 1e-05, %v568_v25  ;;  %v601_v34 = vadd.f32 1e-05, %v569_v32  ;;  %v2341_v27 = vpop.eup %2340 }
 0x1cd   : > { %v514_v35 = vpop.xlane.xlu1 %513  ;;  %v516_v36 = vpop.xlane.xlu0 %515  ;;  %v659_v49 = vmul.f32 %v2341_v27, %v3128_v38 }
 0x1ce   : > { %2350 = vrsqrt.f32 %v600_v33  ;;  %v570_v9 = vmul.f32 0.0078125, %v514_v35  ;;  %v571_v41 = vmul.f32 0.0078125, %v516_v36 }
 0x1cf   : > { %2352 = vrsqrt.f32 %v601_v34 }
 0x1d0   : > { %v2343_v42 = vpop.eup %2342  ;;  %v602_v43 = vadd.f32 1e-05, %v570_v9  ;;  %v603_v44 = vadd.f32 1e-05, %v571_v41 }
 0x1d1   : > { %v518_v29 = vpop.xlane.xlu1 %517  ;;  %v520_v48 = vpop.xlane.xlu0 %519  ;;  %v660_v50 = vmul.f32 %v2343_v42, %v3136_v45 }
 0x1d2   : > { %v2345_v30 = vpop.eup %2344  ;;  %2354 = vrsqrt.f32 %v602_v43  ;;  %v572_v51 = vmul.f32 0.0078125, %v518_v29  ;;  %v573_v52 = vmul.f32 0.0078125, %v520_v48 }
 0x1d3   : > { %v691_v55 = vpack.c.bf16 %v660_v50, %v659_v49  ;;  %2356 = vrsqrt.f32 %v603_v44  ;;  %v661_v60 = vmul.f32 %v2345_v30, %v3131_v39 }
 0x1d4   : > { %v2347_v56 = vpop.eup %2346  ;;  %v604_v31 = vadd.f32 1e-05, %v572_v51  ;;  %v605_v57 = vadd.f32 1e-05, %v573_v52 }
 0x1d5   : > { %v522_v58 = vpop.xlane.xlu1 %521  ;;  %2079 = vmatprep.mubr.bf16.mxu0 %v691_v55  ;;  %v524_v59 = vpop.xlane.xlu0 %523  ;;  %v662_v23 = vmul.f32 %v2347_v56, %v3139_v46 }
 0x1d6   : > { %v2349_v0 = vpop.eup %2348  ;;  %2358 = vrsqrt.f32 %v604_v31  ;;  %v574_v38 = vmul.f32 0.0078125, %v522_v58  ;;  %v575_v45 = vmul.f32 0.0078125, %v524_v59 }
 0x1d7   : > { %v692_v1 = vpack.c.bf16 %v662_v23, %v661_v60  ;;  %2360 = vrsqrt.f32 %v605_v57  ;;  %v663_v33 = vmul.f32 %v2349_v0, %v3146_v53 }
 0x1d8   : > { %v2351_v2 = vpop.eup %2350  ;;  %v606_v3 = vadd.f32 1e-05, %v574_v38  ;;  %v607_v4 = vadd.f32 1e-05, %v575_v45 }
 0x1d9   : > { %v526_v25 = vpop.xlane.xlu1 %525  ;;  %2080 = vmatmul.mubr.bf16.vlgmr.msra.gmra.mrb[0].mxu0 %v692_v1  ;;  %v528_v32 = vpop.xlane.xlu0 %527  ;;  %v664_v34 = vmul.f32 %v2351_v2, %v3149_v54 }
 0x1da   : > { %v2353_v35 = vpop.eup %2352  ;;  %2362 = vrsqrt.f32 %v606_v3  ;;  %v576_v39 = vmul.f32 0.0078125, %v526_v25  ;;  %v577_v46 = vmul.f32 0.0078125, %v528_v32 }
 0x1db   : > { %v693_v36 = vpack.c.bf16 %v664_v34, %v663_v33  ;;  %2364 = vrsqrt.f32 %v607_v4  ;;  %v665_v44 = vmul.f32 %v2353_v35, %v3156_v61 }
 0x1dc   : > { %v2355_v27 = vpop.eup %2354  ;;  %v608_v9 = vadd.f32 1e-05, %v576_v39  ;;  %v609_v41 = vadd.f32 1e-05, %v577_v46 }
 0x1dd   : > { %v530_v42 = vpop.xlane.xlu1 %529  ;;  %2083 = vmatprep.mubr.bf16.mxu0 %v693_v36  ;;  %v532_v43 = vpop.xlane.xlu0 %531  ;;  %v666_v29 = vmul.f32 %v2355_v27, %v3159_v62 }
 0x1de   : > { %v2357_v48 = vpop.eup %2356  ;;  %2366 = vrsqrt.f32 %v608_v9  ;;  %v578_v53 = vmul.f32 0.0078125, %v530_v42  ;;  %v579_v54 = vmul.f32 0.0078125, %v532_v43 }
 0x1df   : > { %v694_v49 = vpack.c.bf16 %v666_v29, %v665_v44  ;;  %2368 = vrsqrt.f32 %v609_v41  ;;  %v667_v56 = vmul.f32 %v2357_v48, %v3166_v5 }
 0x1e0   : > { %v2359_v50 = vpop.eup %2358  ;;  %v610_v30 = vadd.f32 1e-05, %v578_v53  ;;  %v611_v51 = vadd.f32 1e-05, %v579_v54 }
 0x1e1   : > { %v534_v52 = vpop.xlane.xlu1 %533  ;;  %2084 = vmatmul.mubr.bf16.gmra.mrb[4].mxu0 %v694_v49  ;;  %v536_v55 = vpop.xlane.xlu0 %535  ;;  %v668_v31 = vmul.f32 %v2359_v50, %v3169_v6 }
 0x1e2   : > { %v2361_v57 = vpop.eup %2360  ;;  %2370 = vrsqrt.f32 %v610_v30  ;;  %v580_v61 = vmul.f32 0.0078125, %v534_v52  ;;  %v581_v62 = vmul.f32 0.0078125, %v536_v55 }
 0x1e3   : > { %v695_v58 = vpack.c.bf16 %v668_v31, %v667_v56  ;;  %2372 = vrsqrt.f32 %v611_v51  ;;  %v669_v45 = vmul.f32 %v2361_v57, %v3176_v40 }
 0x1e4   : > { %v2363_v59 = vpop.eup %2362  ;;  %v612_v60 = vadd.f32 1e-05, %v580_v61  ;;  %v613_v23 = vadd.f32 1e-05, %v581_v62 }
 0x1e5   : > { %v538_v0 = vpop.xlane.xlu1 %537  ;;  %2087 = vmatprep.mubr.bf16.mxu0 %v695_v58  ;;  %v540_v38 = vpop.xlane.xlu0 %539  ;;  %v670_v1 = vmul.f32 %v2363_v59, %v3179_v8 }
 0x1e6   : > { %v2365_v2 = vpop.eup %2364  ;;  %2374 = vrsqrt.f32 %v612_v60  ;;  %v582_v5 = vmul.f32 0.0078125, %v538_v0  ;;  %v583_v6 = vmul.f32 0.0078125, %v540_v38 }
 0x1e7   : > { %v696_v3 = vpack.c.bf16 %v670_v1, %v669_v45  ;;  %2376 = vrsqrt.f32 %v613_v23  ;;  %v671_v35 = vmul.f32 %v2365_v2, %v3186_v10 }
 0x1e8   : > { %v2367_v4 = vpop.eup %2366  ;;  %v614_v25 = vadd.f32 1e-05, %v582_v5  ;;  %v615_v32 = vadd.f32 1e-05, %v583_v6 }
 0x1e9   : > { %v542_v33 = vpop.xlane.xlu1 %541  ;;  %2088 = vmatmul.mubr.bf16.gmra.mrb[8].mxu0 %v696_v3  ;;  %v544_v34 = vpop.xlane.xlu0 %543  ;;  %v672_v39 = vmul.f32 %v2367_v4, %v3189_v11 }
 0x1ea   : > { %v2369_v46 = vpop.eup %2368  ;;  %2378 = vrsqrt.f32 %v614_v25  ;;  %v584_v40 = vmul.f32 0.0078125, %v542_v33  ;;  %v585_v8 = vmul.f32 0.0078125, %v544_v34 }
 0x1eb   : > { %v697_v36 = vpack.c.bf16 %v672_v39, %v671_v35  ;;  %2380 = vrsqrt.f32 %v615_v32  ;;  %v673_v44 = vmul.f32 %v2369_v46, %v3196_v12 }
 0x1ec   : > { %v2371_v27 = vpop.eup %2370  ;;  %v616_v9 = vadd.f32 1e-05, %v584_v40  ;;  %v617_v41 = vadd.f32 1e-05, %v585_v8 }
 0x1ed   : > { %v546_v42 = vpop.xlane.xlu1 %545  ;;  %2091 = vmatprep.mubr.bf16.mxu0 %v697_v36  ;;  %v548_v43 = vpop.xlane.xlu0 %547  ;;  %v674_v29 = vmul.f32 %v2371_v27, %v3199_v13 }
 0x1ee   : > { %v2373_v48 = vpop.eup %2372  ;;  %2382 = vrsqrt.f32 %v616_v9  ;;  %v586_v10 = vmul.f32 0.0078125, %v546_v42  ;;  %v587_v11 = vmul.f32 0.0078125, %v548_v43 }
 0x1ef   : > { %v698_v53 = vpack.c.bf16 %v674_v29, %v673_v44  ;;  %2384 = vrsqrt.f32 %v617_v41  ;;  %v675_v52 = vmul.f32 %v2373_v48, %v3206_v14 }
 0x1f0   : > { %v2375_v54 = vpop.eup %2374  ;;  %v618_v49 = vadd.f32 1e-05, %v586_v10  ;;  %v619_v50 = vadd.f32 1e-05, %v587_v11 }
 0x1f1   : > { %v550_v30 = vpop.xlane.xlu1 %549  ;;  %2092 = vmatmul.mubr.bf16.gmra.mrb[12].mxu0 %v698_v53  ;;  %v552_v51 = vpop.xlane.xlu0 %551  ;;  %v676_v55 = vmul.f32 %v2375_v54, %v3209_v15 }
 0x1f2   : > { %v2377_v56 = vpop.eup %2376  ;;  %2386 = vrsqrt.f32 %v618_v49  ;;  %v588_v12 = vmul.f32 0.0078125, %v550_v30  ;;  %v589_v13 = vmul.f32 0.0078125, %v552_v51  ;;  %v2326_v51 = vld [vmem:[#allocation7 + $0x10] sm:$0xff]  }
 0x1f3   : > { %v699_v31 = vpack.c.bf16 %v676_v55, %v675_v52  ;;  %2388 = vrsqrt.f32 %v619_v50  ;;  %v677_v60 = vmul.f32 %v2377_v56, %v3216_v16  ;;  %v2330_v52 = vld [vmem:[#allocation7 + $0x30] sm:$0xff]   ;;  %v2331_v56 = vld [vmem:[#allocation7 + $0x38] sm:$0xff]  }
 0x1f4   : > { %v2379_v57 = vpop.eup %2378  ;;  %v620_v61 = vadd.f32 1e-05, %v588_v12  ;;  %v621_v62 = vadd.f32 1e-05, %v589_v13  ;;  %v707_v13 = vld [vmem:[#allocation10] sm:$0xff] }
 0x1f5   : > { %v554_v58 = vpop.xlane.xlu1 %553  ;;  %2095 = vmatprep.mubr.bf16.mxu1 %v699_v31  ;;  %v556_v59 = vpop.xlane.xlu0 %555  ;;  %v678_v23 = vmul.f32 %v2379_v57, %v3219_v17  ;;  %v3324_v57 = vpack.c.bf16 %v707_v13, %v707_v13 }
 0x1f6   : > { %v2381_v0 = vpop.eup %2380  ;;  %2390 = vrsqrt.f32 %v620_v61  ;;  %v590_v14 = vmul.f32 0.0078125, %v554_v58  ;;  %v591_v15 = vmul.f32 0.0078125, %v556_v59 }
 0x1f7   : > { %v700_v38 = vpack.c.bf16 %v678_v23, %v677_v60  ;;  %2392 = vrsqrt.f32 %v621_v62  ;;  %v679_v3 = vmul.f32 %v2381_v0, %v3226_v18  ;;  %v951_v61 = vpack.i.b16 %v3324_v57, %v3324_v57 }
 0x1f8   : > { %v2383_v45 = vpop.eup %2382  ;;  %v622_v1 = vadd.f32 1e-05, %v590_v14  ;;  %v623_v2 = vadd.f32 1e-05, %v591_v15 }
 0x1f9   : > { %v558_v5 = vpop.xlane.xlu1 %557  ;;  %2096 = vmatmul.mubr.bf16.vlgmr.msra.gmra.mrb[0].mxu1 %v700_v38  ;;  %v560_v6 = vpop.xlane.xlu0 %559  ;;  %v680_v4 = vmul.f32 %v2383_v45, %v3229_v19 }
 0x1fa   : > { %v2385_v25 = vpop.eup %2384  ;;  %2394 = vrsqrt.f32 %v622_v1  ;;  %v592_v16 = vmul.f32 0.0078125, %v558_v5  ;;  %v593_v17 = vmul.f32 0.0078125, %v560_v6 }
 0x1fb   : > { %v701_v32 = vpack.c.bf16 %v680_v4, %v679_v3  ;;  %2396 = vrsqrt.f32 %v623_v2  ;;  %v681_v46 = vmul.f32 %v2385_v25, %v3236_v20 }
 0x1fc   : > { %v2387_v33 = vpop.eup %2386  ;;  %v624_v34 = vadd.f32 1e-05, %v592_v16  ;;  %v625_v35 = vadd.f32 1e-05, %v593_v17 }
 0x1fd   : > { %v562_v39 = vpop.xlane.xlu1 %561  ;;  %2099 = vmatprep.mubr.bf16.mxu1 %v701_v32  ;;  %v682_v40 = vmul.f32 %v2387_v33, %v3239_v21  ;;  %v2389_v8 = vpop.eup %2388 }
 0x1fe   : > { %2398 = vrsqrt.f32 %v624_v34  ;;  %v594_v18 = vmul.f32 0.0078125, %v562_v39  ;;  %v683_v9 = vmul.f32 %v2389_v8, %v3246_v63 }
 0x1ff   : > { %v702_v36 = vpack.c.bf16 %v682_v40, %v681_v46  ;;  %2400 = vrsqrt.f32 %v625_v35 }
 0x200   : > { %v2391_v19 = vpop.eup %2390  ;;  %v626_v27 = vadd.f32 1e-05, %v594_v18 }
 0x201   : > { %2100 = vmatmul.mubr.bf16.gmra.mrb[4].mxu1 %v702_v36  ;;  %v684_v41 = vmul.f32 %v2391_v19, %v3249_v22  ;;  %v2393_v42 = vpop.eup %2392 }
 0x202   : > { %2402 = vrsqrt.f32 %v626_v27  ;;  %v685_v20 = vmul.f32 %v2393_v42, %v3256_v7  ;;  %v2324_v7 = vld [vmem:[#allocation7] sm:$0xff]  }
 0x203   : > { %v703_v43 = vpack.c.bf16 %v684_v41, %v683_v9  ;;  %2111 = vmatprep.subr.bf16.mxu1 %v2324_v7 }
 0x204   : > { %v2395_v44 = vpop.eup %2394  ;;  %2112 = vmatpush3.bf16.msra.mxu1 %v2324_v7 }
 0x205   : > { %2103 = vmatprep.mubr.bf16.mxu1 %v703_v43  ;;  %v686_v21 = vmul.f32 %v2395_v44, %v3259_v24  ;;  %v2397_v29 = vpop.eup %2396  ;;  %v2325_v24 = vld [vmem:[#allocation7 + $0x8] sm:$0xff]  }
 0x206   : > { %v687_v11 = vmul.f32 %v2397_v29, %v3266_v37  ;;  %2113 = vmatprep.subr.bf16.mxu1 %v2325_v24  ;;  %v2327_v37 = vld [vmem:[#allocation7 + $0x18] sm:$0xff]  }
 0x207   : > { %v704_v48 = vpack.c.bf16 %v686_v21, %v685_v20 }
 0x208   : > { %v2399_v10 = vpop.eup %2398  ;;  %2114 = vmatpush3.bf16.msra.mxu1 %v2325_v24 }
 0x209   : > { %2104 = vmatmul.mubr.bf16.gmra.mrb[8].mxu1 %v704_v48  ;;  %v688_v53 = vmul.f32 %v2399_v10, %v3269_v26  ;;  %v2401_v63 = vpop.eup %2400  ;;  %2115 = vmatprep.subr.bf16.mxu1 %v2326_v51  ;;  %v2328_v26 = vld [vmem:[#allocation7 + $0x20] sm:$0xff]  }
 0x20a   : > { %v689_v49 = vmul.f32 %v2401_v63, %v3276_v47  ;;  %v2329_v47 = vld [vmem:[#allocation7 + $0x28] sm:$0xff]  }
 0x20b   : > { %v705_v54 = vpack.c.bf16 %v688_v53, %v687_v11 }
 0x20c   : > { %v2403_v22 = vpop.eup %2402  ;;  %2116 = vmatpush3.bf16.msra.mxu1 %v2326_v51 }
 0x20d   : > { %2107 = vmatprep.mubr.bf16.mxu1 %v705_v54  ;;  %v690_v50 = vmul.f32 %v2403_v22, %v3279_v28  ;;  %2117 = vmatprep.subr.bf16.mxu1 %v2327_v37  ;;  %v953_v28 = vlaneseq }
 0x20f   : > { %v706_v30 = vpack.c.bf16 %v690_v50, %v689_v49  ;;  %v3319_v55 = vshrl.u32 %v953_v28, 7 }
 0x210   : > { %2118 = vmatpush3.bf16.msra.mxu1 %v2327_v37 }
 0x211   : > { %2108 = vmatmul.mubr.bf16.gmra.mrb[12].mxu1 %v706_v30  ;;  %2119 = vmatprep.subr.bf16.mxu1 %v2328_v26  ;;  %v1543_v12 = vsub.s32 2, %v3319_v55  ;;  %v955_v62 = vsub.s32 0, %v3319_v55 }
 0x213   : > { %v3322_v31 = vrot.slane %v707_v13, %v1543_v12  ;;  %v3331_v60 = vrot.slane %v951_v61, %v955_v62 }
 0x214   : > { %2120 = vmatpush3.bf16.msra.mxu1 %v2328_v26 }
 0x215   : > { %2121 = vmatprep.subr.bf16.mxu1 %v2329_v47 }
 0x218   : > { %2122 = vmatpush3.bf16.msra.mxu1 %v2329_v47 }
 0x219   : > { %2123 = vmatprep.subr.bf16.mxu1 %v2330_v52 }
 0x21c   : > { %2124 = vmatpush3.bf16.msra.mxu1 %v2330_v52 }
 0x21d   : > { %2125 = vmatprep.subr.bf16.mxu1 %v2331_v56 }
 0x220   : > { %2126 = vmatpush3.bf16.msra.mxu1 %v2331_v56 }
 0x2ac   : > { %v2081_v58 = vpop.f32.mrb[0].mxu0 }
 0x2ad   : > { %v807_v59 = vpop.f32.mrb[1].mxu0 }
 0x2ae   : > { %v2082_v23 = vpop.f32.mrb[2].mxu0 }
 0x2af   : > { %v935_v0 = vpack.c.bf16 %v2082_v23, %v2081_v58  ;;  %v810_v14 = vpop.f32.mrb[3].mxu0 }
 0x2b0   : > { %v934_v15 = vpack.c.bf16 %v810_v14, %v807_v59 }
 0x2b1   : > { %v3334_v38 = vadd.bf16 %v3331_v60, %v935_v0 }
 0x2b2   : > { %v3337_v45 = vadd.bf16 %v3331_v60, %v934_v15 }
 0x2b3   : > { %v974_v1 = vmul.bf16 %v3334_v38, %v3334_v38 }
 0x2b4   : > { %v973_v2 = vmul.bf16 %v3337_v45, %v3337_v45  ;;  %v2085_v5 = vpop.f32.mrb[4].mxu0 }
 0x2b5   : > { %v990_v6 = vmul.bf16 %v974_v1, %v3334_v38  ;;  %v823_v3 = vpop.f32.mrb[5].mxu0 }
 0x2b6   : > { %v989_v4 = vmul.bf16 %v973_v2, %v3337_v45  ;;  %v2086_v25 = vpop.f32.mrb[6].mxu0 }
 0x2b7   : > { %v1006_v16 = vmul.bf16 1027030327, %v990_v6  ;;  %v937_v17 = vpack.c.bf16 %v2086_v25, %v2085_v5  ;;  %v826_v32 = vpop.f32.mrb[7].mxu0 }
 0x2b8   : > { %v1005_v33 = vmul.bf16 1027030327, %v989_v4  ;;  %v936_v34 = vpack.c.bf16 %v826_v32, %v823_v3 }
 0x2b9   : > { %v1022_v35 = vadd.bf16 %v1006_v16, %v3334_v38  ;;  %v3347_v39 = vadd.bf16 %v3331_v60, %v937_v17 }
 0x2ba   : > { %v3350_v46 = vadd.bf16 %v3331_v60, %v936_v34  ;;  %v1021_v40 = vadd.bf16 %v1005_v33, %v3337_v45 }
 0x2bb   : > { %v1038_v8 = vmul.bf16 1061961548, %v1022_v35  ;;  %v976_v18 = vmul.bf16 %v3347_v39, %v3347_v39 }
 0x2bc   : > { %v975_v36 = vmul.bf16 %v3350_v46, %v3350_v46  ;;  %v2089_v19 = vpop.f32.mrb[8].mxu0  ;;  %v1037_v27 = vmul.bf16 1061961548, %v1021_v40 }
 0x2bd   : > { %2404 = vtanh.bf16 %v1038_v8  ;;  %v992_v9 = vmul.bf16 %v976_v18, %v3347_v39  ;;  %v839_v41 = vpop.f32.mrb[9].mxu0 }
 0x2be   : > { %v991_v42 = vmul.bf16 %v975_v36, %v3350_v46  ;;  %v2090_v43 = vpop.f32.mrb[10].mxu0  ;;  %2406 = vtanh.bf16 %v1037_v27 }
 0x2bf   : > { %v1008_v44 = vmul.bf16 1027030327, %v992_v9  ;;  %v939_v20 = vpack.c.bf16 %v2090_v43, %v2089_v19  ;;  %v842_v21 = vpop.f32.mrb[11].mxu0 }
 0x2c0   : > { %v1007_v29 = vmul.bf16 1027030327, %v991_v42  ;;  %v938_v48 = vpack.c.bf16 %v842_v21, %v839_v41 }
 0x2c1   : > { %v3360_v10 = vadd.bf16 %v3331_v60, %v939_v20  ;;  %v1024_v11 = vadd.bf16 %v1008_v44, %v3347_v39 }
 0x2c2   : > { %v3364_v53 = vadd.bf16 %v3331_v60, %v938_v48  ;;  %v1023_v63 = vadd.bf16 %v1007_v29, %v3350_v46 }
 0x2c3   : > { %v978_v54 = vmul.bf16 %v3360_v10, %v3360_v10  ;;  %v1040_v22 = vmul.bf16 1061961548, %v1024_v11 }
 0x2c4   : > { %v977_v49 = vmul.bf16 %v3364_v53, %v3364_v53  ;;  %v2093_v50 = vpop.f32.mrb[12].mxu0  ;;  %v1039_v30 = vmul.bf16 1061961548, %v1023_v63 }
 0x2c5   : > { %v994_v7 = vmul.bf16 %v978_v54, %v3360_v10  ;;  %v855_v24 = vpop.f32.mrb[13].mxu0  ;;  %2408 = vtanh.bf16 %v1040_v22 }
 0x2c6   : > { %v993_v51 = vmul.bf16 %v977_v49, %v3364_v53  ;;  %v2094_v37 = vpop.f32.mrb[14].mxu0  ;;  %2410 = vtanh.bf16 %v1039_v30 }
 0x2c7   : > { %v1010_v26 = vmul.bf16 1027030327, %v994_v7  ;;  %v941_v47 = vpack.c.bf16 %v2094_v37, %v2093_v50  ;;  %v858_v28 = vpop.f32.mrb[15].mxu0 }
 0x2c8   : > { %v2405_v52 = vpop.eup %2404  ;;  %v1009_v56 = vmul.bf16 1027030327, %v993_v51  ;;  %v940_v12 = vpack.c.bf16 %v858_v28, %v855_v24 }
 0x2c9   : > { %v2407_v13 = vpop.eup %2406  ;;  %v1070_v61 = vadd.bf16 1065369472, %v2405_v52  ;;  %v3374_v58 = vadd.bf16 %v3331_v60, %v941_v47  ;;  %v1026_v59 = vadd.bf16 %v1010_v26, %v3360_v10 }
 0x2ca   : > { %v3378_v23 = vadd.bf16 %v3331_v60, %v940_v12  ;;  %v1069_v0 = vadd.bf16 1065369472, %v2407_v13  ;;  %v1025_v14 = vadd.bf16 %v1009_v56, %v3364_v53 }
 0x2cb   : > { %v1086_v15 = vmul.bf16 1056980736, %v1070_v61  ;;  %v980_v1 = vmul.bf16 %v3374_v58, %v3374_v58  ;;  %v1042_v2 = vmul.bf16 1061961548, %v1026_v59 }
 0x2cc   : > { %v979_v5 = vmul.bf16 %v3378_v23, %v3378_v23  ;;  %v2097_v6 = vpop.f32.mrb[0].mxu1  ;;  %v1085_v3 = vmul.bf16 1056980736, %v1069_v0  ;;  %v1041_v4 = vmul.bf16 1061961548, %v1025_v14 }
 0x2cd   : > { %v996_v25 = vmul.bf16 %v980_v1, %v3374_v58  ;;  %v871_v16 = vpop.f32.mrb[1].mxu1  ;;  %2412 = vtanh.bf16 %v1042_v2  ;;  %v1102_v34 = vmul.bf16 %v1086_v15, %v3334_v38 }
 0x2ce   : > { %v995_v17 = vmul.bf16 %v979_v5, %v3378_v23  ;;  %v2098_v32 = vpop.f32.mrb[2].mxu1  ;;  %v1101_v33 = vmul.bf16 %v1085_v3, %v3337_v45  ;;  %2414 = vtanh.bf16 %v1041_v4 }
 0x2cf   : > { %v1012_v35 = vmul.bf16 1027030327, %v996_v25  ;;  %v943_v40 = vpack.c.bf16 %v2098_v32, %v2097_v6  ;;  %v874_v8 = vpop.f32.mrb[3].mxu1 }
 0x2d0   : > { %v2409_v18 = vpop.eup %2408  ;;  %v1011_v36 = vmul.bf16 1027030327, %v995_v17  ;;  %v942_v19 = vpack.c.bf16 %v874_v8, %v871_v16  ;;  %2127 = vmatprep.mubr.bf16.mxu1 %v1101_v33 }
 0x2d1   : > { %v2411_v27 = vpop.eup %2410  ;;  %v3390_v9 = vadd.bf16 %v3331_v60, %v943_v40  ;;  %2128 = vmatmul.mubr.bf16.vlgmr.msra.gmra.mrb[16].mxu1 %v1102_v34  ;;  %v1072_v41 = vadd.bf16 1065369472, %v2409_v18  ;;  %v1028_v42 = vadd.bf16 %v1012_v35, %v3374_v58 }
 0x2d2   : > { %v3394_v45 = vadd.bf16 %v3331_v60, %v942_v19  ;;  %v1071_v43 = vadd.bf16 1065369472, %v2411_v27  ;;  %v1027_v38 = vadd.bf16 %v1011_v36, %v3378_v23 }
 0x2d3   : > { %v982_v44 = vmul.bf16 %v3390_v9, %v3390_v9  ;;  %v1088_v20 = vmul.bf16 1056980736, %v1072_v41  ;;  %v1044_v21 = vmul.bf16 1061961548, %v1028_v42 }
 0x2d4   : > { %v981_v29 = vmul.bf16 %v3394_v45, %v3394_v45  ;;  %v2101_v48 = vpop.f32.mrb[4].mxu1  ;;  %v1087_v11 = vmul.bf16 1056980736, %v1071_v43  ;;  %v1043_v63 = vmul.bf16 1061961548, %v1027_v38 }
 0x2d5   : > { %v998_v54 = vmul.bf16 %v982_v44, %v3390_v9  ;;  %v887_v22 = vpop.f32.mrb[5].mxu1  ;;  %2416 = vtanh.bf16 %v1044_v21  ;;  %v1104_v37 = vmul.bf16 %v1088_v20, %v3347_v39 }
 0x2d6   : > { %v997_v49 = vmul.bf16 %v981_v29, %v3394_v45  ;;  %v2102_v50 = vpop.f32.mrb[6].mxu1  ;;  %v1103_v30 = vmul.bf16 %v1087_v11, %v3350_v46  ;;  %2418 = vtanh.bf16 %v1043_v63 }
 0x2d7   : > { %v1014_v7 = vmul.bf16 1027030327, %v998_v54  ;;  %v945_v24 = vpack.c.bf16 %v2102_v50, %v2101_v48  ;;  %v890_v51 = vpop.f32.mrb[7].mxu1 }
 0x2d8   : > { %v2413_v26 = vpop.eup %2412  ;;  %v1013_v47 = vmul.bf16 1027030327, %v997_v49  ;;  %v944_v28 = vpack.c.bf16 %v890_v51, %v887_v22  ;;  %2131 = vmatprep.mubr.bf16.mxu1 %v1103_v30 }
 0x2d9   : > { %v2415_v52 = vpop.eup %2414  ;;  %v3406_v56 = vadd.bf16 %v3331_v60, %v945_v24  ;;  %2132 = vmatmul.mubr.bf16.gmra.mrb[20].mxu1 %v1104_v37  ;;  %v1074_v12 = vadd.bf16 1065369472, %v2413_v26  ;;  %v1030_v13 = vadd.bf16 %v1014_v7, %v3390_v9 }
 0x2da   : > { %v3410_v46 = vadd.bf16 %v3331_v60, %v944_v28  ;;  %v1073_v61 = vadd.bf16 1065369472, %v2415_v52  ;;  %v1029_v59 = vadd.bf16 %v1013_v47, %v3394_v45 }
 0x2db   : > { %v984_v39 = vmul.bf16 %v3406_v56, %v3406_v56  ;;  %v1090_v0 = vmul.bf16 1056980736, %v1074_v12  ;;  %v1046_v14 = vmul.bf16 1061961548, %v1030_v13 }
 0x2dc   : > { %v983_v15 = vmul.bf16 %v3410_v46, %v3410_v46  ;;  %v2105_v1 = vpop.f32.mrb[8].mxu1  ;;  %v1089_v2 = vmul.bf16 1056980736, %v1073_v61  ;;  %v1045_v5 = vmul.bf16 1061961548, %v1029_v59 }
 0x2dd   : > { %v1000_v6 = vmul.bf16 %v984_v39, %v3406_v56  ;;  %v903_v3 = vpop.f32.mrb[9].mxu1  ;;  %2420 = vtanh.bf16 %v1046_v14  ;;  %v1106_v34 = vmul.bf16 %v1090_v0, %v3360_v10 }
 0x2de   : > { %v999_v4 = vmul.bf16 %v983_v15, %v3410_v46  ;;  %v2106_v25 = vpop.f32.mrb[10].mxu1  ;;  %v1105_v16 = vmul.bf16 %v1089_v2, %v3364_v53  ;;  %2422 = vtanh.bf16 %v1045_v5 }
 0x2df   : > { %v1016_v17 = vmul.bf16 1027030327, %v1000_v6  ;;  %v947_v32 = vpack.c.bf16 %v2106_v25, %v2105_v1  ;;  %v906_v33 = vpop.f32.mrb[11].mxu1 }
 0x2e0   : > { %v2417_v35 = vpop.eup %2416  ;;  %v1015_v40 = vmul.bf16 1027030327, %v999_v4  ;;  %v946_v8 = vpack.c.bf16 %v906_v33, %v903_v3  ;;  %2135 = vmatprep.mubr.bf16.mxu1 %v1105_v16 }
 0x2e1   : > { %v2419_v18 = vpop.eup %2418  ;;  %v3422_v36 = vadd.bf16 %v3331_v60, %v947_v32  ;;  %2136 = vmatmul.mubr.bf16.gmra.mrb[24].mxu1 %v1106_v34  ;;  %v1076_v19 = vadd.bf16 1065369472, %v2417_v35  ;;  %v1032_v27 = vadd.bf16 %v1016_v17, %v3406_v56 }
 0x2e2   : > { %v3426_v53 = vadd.bf16 %v3331_v60, %v946_v8  ;;  %v1075_v41 = vadd.bf16 1065369472, %v2419_v18  ;;  %v1031_v42 = vadd.bf16 %v1015_v40, %v3410_v46 }
 0x2e3   : > { %v986_v10 = vmul.bf16 %v3422_v36, %v3422_v36  ;;  %v1092_v43 = vmul.bf16 1056980736, %v1076_v19  ;;  %v1048_v38 = vmul.bf16 1061961548, %v1032_v27 }
 0x2e4   : > { %v985_v44 = vmul.bf16 %v3426_v53, %v3426_v53  ;;  %v2109_v20 = vpop.f32.mrb[12].mxu1  ;;  %v1091_v21 = vmul.bf16 1056980736, %v1075_v41  ;;  %v1047_v29 = vmul.bf16 1061961548, %v1031_v42 }
 0x2e5   : > { %v1002_v48 = vmul.bf16 %v986_v10, %v3422_v36  ;;  %v919_v11 = vpop.f32.mrb[13].mxu1  ;;  %2424 = vtanh.bf16 %v1048_v38  ;;  %v1108_v7 = vmul.bf16 %v1092_v43, %v3374_v58 }
 0x2e6   : > { %v1001_v63 = vmul.bf16 %v985_v44, %v3426_v53  ;;  %v2110_v54 = vpop.f32.mrb[14].mxu1  ;;  %v1107_v22 = vmul.bf16 %v1091_v21, %v3378_v23  ;;  %2426 = vtanh.bf16 %v1047_v29 }
 0x2e7   : > { %v1018_v49 = vmul.bf16 1027030327, %v1002_v48  ;;  %v949_v50 = vpack.c.bf16 %v2110_v54, %v2109_v20  ;;  %v922_v30 = vpop.f32.mrb[15].mxu1  ;;  %v2336_v54 = vld [vmem:[#allocation8 + $0x20] sm:$0xff]  }
 0x2e8   : > { %v2421_v24 = vpop.eup %2420  ;;  %v1017_v51 = vmul.bf16 1027030327, %v1001_v63  ;;  %v948_v37 = vpack.c.bf16 %v922_v30, %v919_v11  ;;  %2139 = vmatprep.mubr.bf16.mxu1 %v1107_v22  ;;  %v2332_v11 = vld [vmem:[#allocation8] sm:$0xff]   ;;  %v2333_v63 = vld [vmem:[#allocation8 + $0x8] sm:$0xff]   ;;  %v1358_v30 = vshrl.u32 %v3324_v57, 16 }
 0x2e9   : > { %v2423_v26 = vpop.eup %2422  ;;  %v972_v47 = vadd.bf16 %v3331_v60, %v949_v50  ;;  %2140 = vmatmul.mubr.bf16.gmra.mrb[28].mxu1 %v1108_v7  ;;  %v1078_v28 = vadd.bf16 1065369472, %v2421_v24  ;;  %v1034_v52 = vadd.bf16 %v1018_v49, %v3422_v36  ;;  %2159 = vmatprep.subr.bf16.mxu0 %v2332_v11  ;;  %v2337_v22 = vld [vmem:[#allocation8 + $0x28] sm:$0xff]   ;;  %v2338_v49 = vld [vmem:[#allocation8 + $0x30] sm:$0xff]   ;;  %v2339_v50 = vld [vmem:[#allocation8 + $0x38] sm:$0xff]  }
 0x2ea   : > { %v971_v12 = vadd.bf16 %v3331_v60, %v948_v37  ;;  %v1077_v23 = vadd.bf16 1065369472, %v2423_v26  ;;  %v1033_v13 = vadd.bf16 %v1017_v51, %v3426_v53  ;;  %2160 = vmatpush3.bf16.msra.mxu0 %v2332_v11  ;;  %v1359_v7 = vpack.i.b16 %v1358_v30, %v1358_v30 }
 0x2eb   : > { %v988_v61 = vmul.bf16 %v972_v47, %v972_v47  ;;  %v1094_v59 = vmul.bf16 1056980736, %v1078_v28  ;;  %v1050_v39 = vmul.bf16 1061961548, %v1034_v52  ;;  %2161 = vmatprep.subr.bf16.mxu0 %v2333_v63 }
 0x2ec   : > { %v987_v58 = vmul.bf16 %v971_v12, %v971_v12  ;;  %v1093_v0 = vmul.bf16 1056980736, %v1077_v23  ;;  %v1049_v14 = vmul.bf16 1061961548, %v1033_v13  ;;  %v3450_v37 = vrot.slane %v1359_v7, %v955_v62 }
 0x2ed   : > { %v1004_v15 = vmul.bf16 %v988_v61, %v972_v47  ;;  %2428 = vtanh.bf16 %v1050_v39  ;;  %v1110_v6 = vmul.bf16 %v1094_v59, %v3390_v9 }
 0x2ee   : > { %v1003_v1 = vmul.bf16 %v987_v58, %v971_v12  ;;  %v1109_v2 = vmul.bf16 %v1093_v0, %v3394_v45  ;;  %2430 = vtanh.bf16 %v1049_v14  ;;  %2162 = vmatpush3.bf16.msra.mxu0 %v2333_v63 }
 0x2ef   : > { %v1020_v5 = vmul.bf16 1027030327, %v1004_v15 }
 0x2f0   : > { %v2425_v3 = vpop.eup %2424  ;;  %v1019_v60 = vmul.bf16 1027030327, %v1003_v1  ;;  %2143 = vmatprep.mubr.bf16.mxu1 %v1109_v2 }
 0x2f1   : > { %v2427_v4 = vpop.eup %2426  ;;  %2144 = vmatmul.mubr.bf16.gmra.mrb[32].mxu1 %v1110_v6  ;;  %v1080_v25 = vadd.bf16 1065369472, %v2425_v3  ;;  %v1036_v16 = vadd.bf16 %v1020_v5, %v972_v47 }
 0x2f2   : > { %v1079_v17 = vadd.bf16 1065369472, %v2427_v4  ;;  %v1035_v32 = vadd.bf16 %v1019_v60, %v971_v12 }
 0x2f3   : > { %v1096_v33 = vmul.bf16 1056980736, %v1080_v25  ;;  %v1052_v34 = vmul.bf16 1061961548, %v1036_v16 }
 0x2f4   : > { %v1095_v35 = vmul.bf16 1056980736, %v1079_v17  ;;  %v1051_v40 = vmul.bf16 1061961548, %v1035_v32 }
 0x2f5   : > { %2432 = vtanh.bf16 %v1052_v34  ;;  %v1112_v8 = vmul.bf16 %v1096_v33, %v3406_v56 }
 0x2f6   : > { %v1111_v45 = vmul.bf16 %v1095_v35, %v3410_v46  ;;  %2434 = vtanh.bf16 %v1051_v40 }
 0x2f8   : > { %v2429_v9 = vpop.eup %2428  ;;  %2147 = vmatprep.mubr.bf16.mxu1 %v1111_v45 }
 0x2f9   : > { %v2431_v18 = vpop.eup %2430  ;;  %2148 = vmatmul.mubr.bf16.gmra.mrb[36].mxu1 %v1112_v8  ;;  %v1082_v19 = vadd.bf16 1065369472, %v2429_v9 }
 0x2fa   : > { %v1081_v27 = vadd.bf16 1065369472, %v2431_v18 }
 0x2fb   : > { %v1098_v41 = vmul.bf16 1056980736, %v1082_v19 }
 0x2fc   : > { %v1097_v42 = vmul.bf16 1056980736, %v1081_v27 }
 0x2fd   : > { %v1114_v43 = vmul.bf16 %v1098_v41, %v3422_v36  ;;  %v2335_v36 = vld [vmem:[#allocation8 + $0x18] sm:$0xff]  }
 0x2fe   : > { %v1113_v10 = vmul.bf16 %v1097_v42, %v3426_v53  ;;  %v2334_v53 = vld [vmem:[#allocation8 + $0x10] sm:$0xff]  }
 0x2ff   : > { %2163 = vmatprep.subr.bf16.mxu0 %v2334_v53 }
 0x300   : > { %v2433_v38 = vpop.eup %2432  ;;  %2151 = vmatprep.mubr.bf16.mxu1 %v1113_v10  ;;  %2164 = vmatpush3.bf16.msra.mxu0 %v2334_v53 }
 0x301   : > { %v2435_v44 = vpop.eup %2434  ;;  %2152 = vmatmul.mubr.bf16.gmra.mrb[40].mxu1 %v1114_v43  ;;  %v1084_v46 = vadd.bf16 1065369472, %v2433_v38  ;;  %2165 = vmatprep.subr.bf16.mxu0 %v2335_v36 }
 0x302   : > { %v1083_v20 = vadd.bf16 1065369472, %v2435_v44 }
 0x303   : > { %v1100_v21 = vmul.bf16 1056980736, %v1084_v46 }
 0x304   : > { %v1099_v56 = vmul.bf16 1056980736, %v1083_v20  ;;  %2166 = vmatpush3.bf16.msra.mxu0 %v2335_v36 }
 0x305   : > { %v1116_v48 = vmul.bf16 %v1100_v21, %v972_v47  ;;  %2167 = vmatprep.subr.bf16.mxu0 %v2336_v54 }
 0x306   : > { %v1115_v29 = vmul.bf16 %v1099_v56, %v971_v12 }
 0x308   : > { %2155 = vmatprep.mubr.bf16.mxu1 %v1115_v29  ;;  %2168 = vmatpush3.bf16.msra.mxu0 %v2336_v54 }
 0x309   : > { %2156 = vmatmul.mubr.bf16.gmra.mrb[44].mxu1 %v1116_v48  ;;  %2169 = vmatprep.subr.bf16.mxu0 %v2337_v22 }
 0x30c   : > { %2170 = vmatpush3.bf16.msra.mxu0 %v2337_v22 }
 0x30d   : > { %2171 = vmatprep.subr.bf16.mxu0 %v2338_v49 }
 0x310   : > { %2172 = vmatpush3.bf16.msra.mxu0 %v2338_v49 }
 0x311   : > { %2173 = vmatprep.subr.bf16.mxu0 %v2339_v50 }
 0x314   : > { %2174 = vmatpush3.bf16.msra.mxu0 %v2339_v50 }
 0x3a4   : > { %v2129_v24 = vpop.f32.mrb[16].mxu1 }
 0x3a5   : > { %v1215_v51 = vpop.f32.mrb[17].mxu1 }
 0x3a6   : > { %v2130_v26 = vpop.f32.mrb[18].mxu1 }
 0x3a7   : > { %v1343_v47 = vpack.c.bf16 %v2130_v26, %v2129_v24  ;;  %v1218_v28 = vpop.f32.mrb[19].mxu1 }
 0x3a8   : > { %v1342_v52 = vpack.c.bf16 %v1218_v28, %v1215_v51 }
 0x3a9   : > { %v3453_v12 = vadd.bf16 %v3450_v37, %v1343_v47 }
 0x3aa   : > { %v3456_v23 = vadd.bf16 %v3450_v37, %v1342_v52 }
 0x3ab   : > { %v1382_v57 = vmul.bf16 %v3453_v12, %v3453_v12 }
 0x3ac   : > { %v1381_v13 = vmul.bf16 %v3456_v23, %v3456_v23  ;;  %v2133_v61 = vpop.f32.mrb[20].mxu1 }
 0x3ad   : > { %v1398_v55 = vmul.bf16 %v1382_v57, %v3453_v12  ;;  %v1231_v62 = vpop.f32.mrb[21].mxu1 }
 0x3ae   : > { %v1397_v59 = vmul.bf16 %v1381_v13, %v3456_v23  ;;  %v2134_v39 = vpop.f32.mrb[22].mxu1 }
 0x3af   : > { %v1414_v58 = vmul.bf16 1027030327, %v1398_v55  ;;  %v1345_v0 = vpack.c.bf16 %v2134_v39, %v2133_v61  ;;  %v1234_v14 = vpop.f32.mrb[23].mxu1 }
 0x3b0   : > { %v1413_v15 = vmul.bf16 1027030327, %v1397_v59  ;;  %v1344_v1 = vpack.c.bf16 %v1234_v14, %v1231_v62 }
 0x3b1   : > { %v1430_v2 = vadd.bf16 %v1414_v58, %v3453_v12  ;;  %v3466_v5 = vadd.bf16 %v3450_v37, %v1345_v0 }
 0x3b2   : > { %v3469_v6 = vadd.bf16 %v3450_v37, %v1344_v1  ;;  %v1429_v3 = vadd.bf16 %v1413_v15, %v3456_v23 }
 0x3b3   : > { %v1446_v60 = vmul.bf16 1061961548, %v1430_v2  ;;  %v1384_v4 = vmul.bf16 %v3466_v5, %v3466_v5 }
 0x3b4   : > { %v1383_v25 = vmul.bf16 %v3469_v6, %v3469_v6  ;;  %v2137_v16 = vpop.f32.mrb[24].mxu1  ;;  %v1445_v17 = vmul.bf16 1061961548, %v1429_v3 }
 0x3b5   : > { %2436 = vtanh.bf16 %v1446_v60  ;;  %v1400_v32 = vmul.bf16 %v1384_v4, %v3466_v5  ;;  %v1247_v33 = vpop.f32.mrb[25].mxu1 }
 0x3b6   : > { %v1399_v34 = vmul.bf16 %v1383_v25, %v3469_v6  ;;  %v2138_v35 = vpop.f32.mrb[26].mxu1  ;;  %2438 = vtanh.bf16 %v1445_v17 }
 0x3b7   : > { %v1416_v40 = vmul.bf16 1027030327, %v1400_v32  ;;  %v1347_v45 = vpack.c.bf16 %v2138_v35, %v2137_v16  ;;  %v1250_v8 = vpop.f32.mrb[27].mxu1 }
 0x3b8   : > { %v1415_v9 = vmul.bf16 1027030327, %v1399_v34  ;;  %v1346_v18 = vpack.c.bf16 %v1250_v8, %v1247_v33 }
 0x3b9   : > { %v3479_v19 = vadd.bf16 %v3450_v37, %v1347_v45  ;;  %v1432_v27 = vadd.bf16 %v1416_v40, %v3466_v5 }
 0x3ba   : > { %v3483_v41 = vadd.bf16 %v3450_v37, %v1346_v18  ;;  %v1431_v42 = vadd.bf16 %v1415_v9, %v3469_v6 }
 0x3bb   : > { %v1386_v10 = vmul.bf16 %v3479_v19, %v3479_v19  ;;  %v1448_v43 = vmul.bf16 1061961548, %v1432_v27 }
 0x3bc   : > { %v1385_v38 = vmul.bf16 %v3483_v41, %v3483_v41  ;;  %v2141_v44 = vpop.f32.mrb[28].mxu1  ;;  %v1447_v46 = vmul.bf16 1061961548, %v1431_v42 }
 0x3bd   : > { %v1402_v20 = vmul.bf16 %v1386_v10, %v3479_v19  ;;  %v1263_v21 = vpop.f32.mrb[29].mxu1  ;;  %2440 = vtanh.bf16 %v1448_v43 }
 0x3be   : > { %v1401_v56 = vmul.bf16 %v1385_v38, %v3483_v41  ;;  %v2142_v29 = vpop.f32.mrb[30].mxu1  ;;  %2442 = vtanh.bf16 %v1447_v46 }
 0x3bf   : > { %v1418_v48 = vmul.bf16 1027030327, %v1402_v20  ;;  %v1349_v11 = vpack.c.bf16 %v2142_v29, %v2141_v44  ;;  %v1266_v63 = vpop.f32.mrb[31].mxu1 }
 0x3c0   : > { %v2437_v53 = vpop.eup %2436  ;;  %v1417_v36 = vmul.bf16 1027030327, %v1401_v56  ;;  %v1348_v54 = vpack.c.bf16 %v1266_v63, %v1263_v21 }
 0x3c1   : > { %v2439_v22 = vpop.eup %2438  ;;  %v1478_v49 = vadd.bf16 1065369472, %v2437_v53  ;;  %v3493_v50 = vadd.bf16 %v3450_v37, %v1349_v11  ;;  %v1434_v30 = vadd.bf16 %v1418_v48, %v3479_v19 }
 0x3c2   : > { %v3497_v7 = vadd.bf16 %v3450_v37, %v1348_v54  ;;  %v1477_v24 = vadd.bf16 1065369472, %v2439_v22  ;;  %v1433_v51 = vadd.bf16 %v1417_v36, %v3483_v41 }
 0x3c3   : > { %v1494_v26 = vmul.bf16 1056980736, %v1478_v49  ;;  %v1388_v47 = vmul.bf16 %v3493_v50, %v3493_v50  ;;  %v1450_v28 = vmul.bf16 1061961548, %v1434_v30 }
 0x3c4   : > { %v1387_v52 = vmul.bf16 %v3497_v7, %v3497_v7  ;;  %v2145_v57 = vpop.f32.mrb[32].mxu1  ;;  %v1493_v13 = vmul.bf16 1056980736, %v1477_v24  ;;  %v1449_v61 = vmul.bf16 1061961548, %v1433_v51 }
 0x3c5   : > { %v1404_v55 = vmul.bf16 %v1388_v47, %v3493_v50  ;;  %v1279_v62 = vpop.f32.mrb[33].mxu1  ;;  %2444 = vtanh.bf16 %v1450_v28  ;;  %v1510_v0 = vmul.bf16 %v1494_v26, %v3453_v12 }
 0x3c6   : > { %v1403_v59 = vmul.bf16 %v1387_v52, %v3497_v7  ;;  %v2146_v39 = vpop.f32.mrb[34].mxu1  ;;  %v1509_v58 = vmul.bf16 %v1493_v13, %v3456_v23  ;;  %2446 = vtanh.bf16 %v1449_v61 }
 0x3c7   : > { %v1420_v14 = vmul.bf16 1027030327, %v1404_v55  ;;  %v1351_v15 = vpack.c.bf16 %v2146_v39, %v2145_v57  ;;  %v1282_v1 = vpop.f32.mrb[35].mxu1 }
 0x3c8   : > { %v2441_v2 = vpop.eup %2440  ;;  %v1419_v3 = vmul.bf16 1027030327, %v1403_v59  ;;  %v1350_v60 = vpack.c.bf16 %v1282_v1, %v1279_v62  ;;  %2175 = vmatprep.mubr.bf16.mxu0 %v1509_v58 }
 0x3c9   : > { %v2443_v4 = vpop.eup %2442  ;;  %v3509_v25 = vadd.bf16 %v3450_v37, %v1351_v15  ;;  %2176 = vmatmul.mubr.bf16.vlgmr.msra.gmra.mrb[16].mxu0 %v1510_v0  ;;  %v1480_v16 = vadd.bf16 1065369472, %v2441_v2  ;;  %v1436_v17 = vadd.bf16 %v1420_v14, %v3493_v50 }
 0x3ca   : > { %v3513_v23 = vadd.bf16 %v3450_v37, %v1350_v60  ;;  %v1479_v32 = vadd.bf16 1065369472, %v2443_v4  ;;  %v1435_v12 = vadd.bf16 %v1419_v3, %v3497_v7 }
 0x3cb   : > { %v1390_v33 = vmul.bf16 %v3509_v25, %v3509_v25  ;;  %v1496_v34 = vmul.bf16 1056980736, %v1480_v16  ;;  %v1452_v35 = vmul.bf16 1061961548, %v1436_v17 }
 0x3cc   : > { %v1389_v40 = vmul.bf16 %v3513_v23, %v3513_v23  ;;  %v2149_v45 = vpop.f32.mrb[36].mxu1  ;;  %v1495_v8 = vmul.bf16 1056980736, %v1479_v32  ;;  %v1451_v9 = vmul.bf16 1061961548, %v1435_v12 }
 0x3cd   : > { %v1406_v18 = vmul.bf16 %v1390_v33, %v3509_v25  ;;  %v1295_v27 = vpop.f32.mrb[37].mxu1  ;;  %2448 = vtanh.bf16 %v1452_v35  ;;  %v1512_v20 = vmul.bf16 %v1496_v34, %v3466_v5 }
 0x3ce   : > { %v1405_v42 = vmul.bf16 %v1389_v40, %v3513_v23  ;;  %v2150_v10 = vpop.f32.mrb[38].mxu1  ;;  %v1511_v43 = vmul.bf16 %v1495_v8, %v3469_v6  ;;  %2450 = vtanh.bf16 %v1451_v9 }
 0x3cf   : > { %v1422_v38 = vmul.bf16 1027030327, %v1406_v18  ;;  %v1353_v44 = vpack.c.bf16 %v2150_v10, %v2149_v45  ;;  %v1298_v46 = vpop.f32.mrb[39].mxu1 }
 0x3d0   : > { %v2445_v21 = vpop.eup %2444  ;;  %v1421_v56 = vmul.bf16 1027030327, %v1405_v42  ;;  %v1352_v29 = vpack.c.bf16 %v1298_v46, %v1295_v27  ;;  %2179 = vmatprep.mubr.bf16.mxu0 %v1511_v43 }
 0x3d1   : > { %v2447_v48 = vpop.eup %2446  ;;  %v3525_v11 = vadd.bf16 %v3450_v37, %v1353_v44  ;;  %2180 = vmatmul.mubr.bf16.gmra.mrb[20].mxu0 %v1512_v20  ;;  %v1482_v63 = vadd.bf16 1065369472, %v2445_v21  ;;  %v1438_v53 = vadd.bf16 %v1422_v38, %v3509_v25 }
 0x3d2   : > { %v3529_v6 = vadd.bf16 %v3450_v37, %v1352_v29  ;;  %v1481_v36 = vadd.bf16 1065369472, %v2447_v48  ;;  %v1437_v54 = vadd.bf16 %v1421_v56, %v3513_v23 }
 0x3d3   : > { %v1392_v5 = vmul.bf16 %v3525_v11, %v3525_v11  ;;  %v1498_v22 = vmul.bf16 1056980736, %v1482_v63  ;;  %v1454_v49 = vmul.bf16 1061961548, %v1438_v53 }
 0x3d4   : > { %v1391_v30 = vmul.bf16 %v3529_v6, %v3529_v6  ;;  %v2153_v24 = vpop.f32.mrb[40].mxu1  ;;  %v1497_v51 = vmul.bf16 1056980736, %v1481_v36  ;;  %v1453_v26 = vmul.bf16 1061961548, %v1437_v54 }
 0x3d5   : > { %v1408_v47 = vmul.bf16 %v1392_v5, %v3525_v11  ;;  %v1311_v28 = vpop.f32.mrb[41].mxu1  ;;  %2452 = vtanh.bf16 %v1454_v49  ;;  %v1514_v59 = vmul.bf16 %v1498_v22, %v3479_v19 }
 0x3d6   : > { %v1407_v52 = vmul.bf16 %v1391_v30, %v3529_v6  ;;  %v2154_v57 = vpop.f32.mrb[42].mxu1  ;;  %v1513_v13 = vmul.bf16 %v1497_v51, %v3483_v41  ;;  %2454 = vtanh.bf16 %v1453_v26 }
 0x3d7   : > { %v1424_v61 = vmul.bf16 1027030327, %v1408_v47  ;;  %v1355_v55 = vpack.c.bf16 %v2154_v57, %v2153_v24  ;;  %v1314_v62 = vpop.f32.mrb[43].mxu1 }
 0x3d8   : > { %v2449_v39 = vpop.eup %2448  ;;  %v1423_v58 = vmul.bf16 1027030327, %v1407_v52  ;;  %v1354_v0 = vpack.c.bf16 %v1314_v62, %v1311_v28  ;;  %2183 = vmatprep.mubr.bf16.mxu0 %v1513_v13 }
 0x3d9   : > { %v2451_v14 = vpop.eup %2450  ;;  %v3541_v15 = vadd.bf16 %v3450_v37, %v1355_v55  ;;  %2184 = vmatmul.mubr.bf16.gmra.mrb[24].mxu0 %v1514_v59  ;;  %v1484_v1 = vadd.bf16 1065369472, %v2449_v39  ;;  %v1440_v2 = vadd.bf16 %v1424_v61, %v3525_v11 }
 0x3da   : > { %v3545_v41 = vadd.bf16 %v3450_v37, %v1354_v0  ;;  %v1483_v3 = vadd.bf16 1065369472, %v2451_v14  ;;  %v1439_v60 = vadd.bf16 %v1423_v58, %v3529_v6 }
 0x3db   : > { %v1394_v19 = vmul.bf16 %v3541_v15, %v3541_v15  ;;  %v1500_v4 = vmul.bf16 1056980736, %v1484_v1  ;;  %v1456_v16 = vmul.bf16 1061961548, %v1440_v2 }
 0x3dc   : > { %v1393_v17 = vmul.bf16 %v3545_v41, %v3545_v41  ;;  %v2157_v32 = vpop.f32.mrb[44].mxu1  ;;  %v1499_v12 = vmul.bf16 1056980736, %v1483_v3  ;;  %v1455_v33 = vmul.bf16 1061961548, %v1439_v60 }
 0x3dd   : > { %v1410_v34 = vmul.bf16 %v1394_v19, %v3541_v15  ;;  %v1327_v35 = vpop.f32.mrb[45].mxu1  ;;  %2456 = vtanh.bf16 %v1456_v16  ;;  %v1516_v42 = vmul.bf16 %v1500_v4, %v3493_v50 }
 0x3de   : > { %v1409_v40 = vmul.bf16 %v1393_v17, %v3545_v41  ;;  %v2158_v45 = vpop.f32.mrb[46].mxu1  ;;  %v1515_v8 = vmul.bf16 %v1499_v12, %v3497_v7  ;;  %2458 = vtanh.bf16 %v1455_v33 }
 0x3df   : > { %v1426_v9 = vmul.bf16 1027030327, %v1410_v34  ;;  %v1357_v18 = vpack.c.bf16 %v2158_v45, %v2157_v32  ;;  %v1330_v27 = vpop.f32.mrb[47].mxu1 }
 0x3e0   : > { %v2453_v10 = vpop.eup %2452  ;;  %v1425_v43 = vmul.bf16 1027030327, %v1409_v40  ;;  %v1356_v38 = vpack.c.bf16 %v1330_v27, %v1327_v35  ;;  %2187 = vmatprep.mubr.bf16.mxu0 %v1515_v8  ;;  %v2468_v35 = vld [vmem:[%s2985_s30 + $0x10] sm:$0xff] }
 0x3e1   : > { %v2455_v44 = vpop.eup %2454  ;;  %v1380_v46 = vadd.bf16 %v3450_v37, %v1357_v18  ;;  %2188 = vmatmul.mubr.bf16.gmra.mrb[28].mxu0 %v1516_v42  ;;  %v1486_v20 = vadd.bf16 1065369472, %v2453_v10  ;;  %v1442_v21 = vadd.bf16 %v1426_v9, %v3541_v15  ;;  %v2469_v9 = vld [vmem:[%s2985_s30] sm:$0xff]  ;;  %v2470_v42 = vld [vmem:[%s2985_s30 + $0x18] sm:$0xff] }
 0x3e2   : > { %v1379_v56 = vadd.bf16 %v3450_v37, %v1356_v38  ;;  %v1485_v7 = vadd.bf16 1065369472, %v2455_v44  ;;  %v1441_v29 = vadd.bf16 %v1425_v43, %v3545_v41  ;;  %v2471_v43 = vld [vmem:[%s2985_s30 + $0x8] sm:$0xff] }
 0x3e3   : > { %v1396_v48 = vmul.bf16 %v1380_v46, %v1380_v46  ;;  %v1502_v63 = vmul.bf16 1056980736, %v1486_v20  ;;  %v1458_v53 = vmul.bf16 1061961548, %v1442_v21 }
 0x3e4   : > { %v1395_v50 = vmul.bf16 %v1379_v56, %v1379_v56  ;;  %v1501_v36 = vmul.bf16 1056980736, %v1485_v7  ;;  %v1457_v54 = vmul.bf16 1061961548, %v1441_v29  ;;  %v2472_v7 = vld [vmem:[%s2985_s30 + $0x30] sm:$0xff] }
 0x3e5   : > { %v1412_v5 = vmul.bf16 %v1396_v48, %v1380_v46  ;;  %2460 = vtanh.bf16 %v1458_v53  ;;  %v1518_v24 = vmul.bf16 %v1502_v63, %v3509_v25  ;;  %v2473_v53 = vld [vmem:[%s2985_s30 + $0x20] sm:$0xff] }
 0x3e6   : > { %v1411_v22 = vmul.bf16 %v1395_v50, %v1379_v56  ;;  %v1517_v49 = vmul.bf16 %v1501_v36, %v3513_v23  ;;  %2462 = vtanh.bf16 %v1457_v54  ;;  %v2474_v54 = vld [vmem:[%s2985_s30 + $0x38] sm:$0xff] }
 0x3e7   : > { %v1428_v30 = vmul.bf16 1027030327, %v1412_v5 }
 0x3e8   : > { %v2457_v51 = vpop.eup %2456  ;;  %v1427_v37 = vmul.bf16 1027030327, %v1411_v22  ;;  %2191 = vmatprep.mubr.bf16.mxu0 %v1517_v49  ;;  %v2475_v22 = vld [vmem:[%s2985_s30 + $0x28] sm:$0xff] }
 0x3e9   : > { %v2459_v26 = vpop.eup %2458  ;;  %2192 = vmatmul.mubr.bf16.gmra.mrb[32].mxu0 %v1518_v24  ;;  %v1488_v47 = vadd.bf16 1065369472, %v2457_v51  ;;  %v1444_v28 = vadd.bf16 %v1428_v30, %v1380_v46 }
 0x3ea   : > { %v1487_v52 = vadd.bf16 1065369472, %v2459_v26  ;;  %v1443_v57 = vadd.bf16 %v1427_v37, %v1379_v56 }
 0x3eb   : > { %v1504_v13 = vmul.bf16 1056980736, %v1488_v47  ;;  %v1460_v61 = vmul.bf16 1061961548, %v1444_v28  ;;  %v2476_v47 = vld [vmem:[%s2985_s30 + $0x50] sm:$0xff] }
 0x3ec   : > { %v1503_v55 = vmul.bf16 1056980736, %v1487_v52  ;;  %v1459_v62 = vmul.bf16 1061961548, %v1443_v57 }
 0x3ed   : > { %2464 = vtanh.bf16 %v1460_v61  ;;  %v1520_v59 = vmul.bf16 %v1504_v13, %v3525_v11  ;;  %v2477_v13 = vld [vmem:[%s2985_s30 + $0x40] sm:$0xff] }
 0x3ee   : > { %v1519_v23 = vmul.bf16 %v1503_v55, %v3529_v6  ;;  %2466 = vtanh.bf16 %v1459_v62  ;;  %v2478_v62 = vld [vmem:[%s2985_s30 + $0x58] sm:$0xff] }
 0x3f0   : > { %v2461_v25 = vpop.eup %2460  ;;  %2195 = vmatprep.mubr.bf16.mxu0 %v1519_v23 }
 0x3f1   : > { %v2463_v39 = vpop.eup %2462  ;;  %2196 = vmatmul.mubr.bf16.gmra.mrb[36].mxu0 %v1520_v59  ;;  %v1490_v58 = vadd.bf16 1065369472, %v2461_v25  ;;  %v2479_v59 = vld [vmem:[%s2985_s30 + $0x48] sm:$0xff] }
 0x3f2   : > { %v1489_v0 = vadd.bf16 1065369472, %v2463_v39 }
 0x3f3   : > { %v1506_v14 = vmul.bf16 1056980736, %v1490_v58 }
 0x3f4   : > { %v1505_v1 = vmul.bf16 1056980736, %v1489_v0 }
 0x3f5   : > { %v1522_v3 = vmul.bf16 %v1506_v14, %v3541_v15 }
 0x3f6   : > { %v1521_v2 = vmul.bf16 %v1505_v1, %v3545_v41 }
 0x3f8   : > { %v2465_v60 = vpop.eup %2464  ;;  %2199 = vmatprep.mubr.bf16.mxu0 %v1521_v2  ;;  %v2480_v2 = vld [vmem:[%s2985_s30 + $0x70] sm:$0xff] }
 0x3f9   : > { %v2467_v19 = vpop.eup %2466  ;;  %2200 = vmatmul.mubr.bf16.gmra.mrb[40].mxu0 %v1522_v3  ;;  %v1492_v6 = vadd.bf16 1065369472, %v2465_v60 }
 0x3fa   : > { %v1491_v4 = vadd.bf16 1065369472, %v2467_v19 }
 0x3fb   : > { %v1508_v11 = vmul.bf16 1056980736, %v1492_v6  ;;  %v2481_v6 = vld [vmem:[%s2985_s30 + $0x60] sm:$0xff] }
 0x3fc   : > { %v1507_v16 = vmul.bf16 1056980736, %v1491_v4 }
 0x3fd   : > { %v1524_v32 = vmul.bf16 %v1508_v11, %v1380_v46 }
 0x3fe   : > { %v1523_v17 = vmul.bf16 %v1507_v16, %v1379_v56  ;;  %v2482_v16 = vld [vmem:[%s2985_s30 + $0x78] sm:$0xff] }
 0x400   : > { %2203 = vmatprep.mubr.bf16.mxu0 %v1523_v17 }
 0x401   : > { %2204 = vmatmul.mubr.bf16.gmra.mrb[44].mxu0 %v1524_v32  ;;  %v2483_v32 = vld [vmem:[%s2985_s30 + $0x68] sm:$0xff] }
 0x49c   : > { %v2177_v12 = vpop.f32.mrb[16].mxu0 }
 0x49d   : > { %v1636_v41 = vadd.f32 %v2177_v12, %v3322_v31  ;;  %v1627_v15 = vpop.f32.mrb[17].mxu0 }
 0x49e   : > { %v1628_v33 = vadd.f32 %v1627_v15, %v3322_v31  ;;  %v2178_v34 = vpop.f32.mrb[18].mxu0 }
 0x49f   : > { %v1756_v40 = vadd.f32 %v2468_v35, %v1636_v41  ;;  %v1639_v45 = vadd.f32 %v2178_v34, %v3322_v31  ;;  %v1630_v8 = vpop.f32.mrb[19].mxu0 }
 0x4a0   : > { %v1754_v18 = vadd.f32 %v2469_v9, %v1628_v33  ;;  %v1631_v27 = vadd.f32 %v1630_v8, %v3322_v31 }
 0x4a1   : > { %1788 = vst [vmem:[%s3574_s24 + $0x10] sm:$0xff] %v1756_v40  ;;  %v1757_v10 = vadd.f32 %v2470_v42, %v1639_v45  ;;  %v2484_v40 = vld [vmem:[%s2985_s30 + $0x90] sm:$0xff] }
 0x4a2   : > { %1786 = vst [vmem:[%s3574_s24] sm:$0xff] %v1754_v18  ;;  %v1755_v38 = vadd.f32 %v2471_v43, %v1631_v27  ;;  %v2485_v18 = vld [vmem:[%s2985_s30 + $0x80] sm:$0xff] }
 0x4a3   : > { %1789 = vst [vmem:[%s3574_s24 + $0x18] sm:$0xff] %v1757_v10  ;;  %v2486_v10 = vld [vmem:[%s2985_s30 + $0x98] sm:$0xff] }
 0x4a4   : > { %1787 = vst [vmem:[%s3574_s24 + $0x8] sm:$0xff] %v1755_v38  ;;  %v2181_v44 = vpop.f32.mrb[20].mxu0  ;;  %v2487_v38 = vld [vmem:[%s2985_s30 + $0x88] sm:$0xff] }
 0x4a5   : > { %v1652_v46 = vadd.f32 %v2181_v44, %v3322_v31  ;;  %v1643_v20 = vpop.f32.mrb[21].mxu0 }
 0x4a6   : > { %v1644_v21 = vadd.f32 %v1643_v20, %v3322_v31  ;;  %v2182_v56 = vpop.f32.mrb[22].mxu0 }
 0x4a7   : > { %v1760_v29 = vadd.f32 %v2472_v7, %v1652_v46  ;;  %v1655_v48 = vadd.f32 %v2182_v56, %v3322_v31  ;;  %v1646_v63 = vpop.f32.mrb[23].mxu0 }
 0x4a8   : > { %v1758_v50 = vadd.f32 %v2473_v53, %v1644_v21  ;;  %v1647_v36 = vadd.f32 %v1646_v63, %v3322_v31 }
 0x4a9   : > { %1792 = vst [vmem:[%s3574_s24 + $0x30] sm:$0xff] %v1760_v29  ;;  %v1761_v5 = vadd.f32 %v2474_v54, %v1655_v48  ;;  %v2488_v29 = vld [vmem:[%s2985_s30 + $0xb0] sm:$0xff] }
 0x4aa   : > { %1790 = vst [vmem:[%s3574_s24 + $0x20] sm:$0xff] %v1758_v50  ;;  %v1759_v49 = vadd.f32 %v2475_v22, %v1647_v36  ;;  %v2489_v50 = vld [vmem:[%s2985_s30 + $0xa0] sm:$0xff] }
 0x4ab   : > { %1793 = vst [vmem:[%s3574_s24 + $0x38] sm:$0xff] %v1761_v5  ;;  %v2490_v5 = vld [vmem:[%s2985_s30 + $0xb8] sm:$0xff] }
 0x4ac   : > { %1791 = vst [vmem:[%s3574_s24 + $0x28] sm:$0xff] %v1759_v49  ;;  %v2185_v30 = vpop.f32.mrb[24].mxu0  ;;  %v2491_v49 = vld [vmem:[%s2985_s30 + $0xa8] sm:$0xff] }
 0x4ad   : > { %v1668_v24 = vadd.f32 %v2185_v30, %v3322_v31  ;;  %v1659_v51 = vpop.f32.mrb[25].mxu0 }
 0x4ae   : > { %v1660_v37 = vadd.f32 %v1659_v51, %v3322_v31  ;;  %v2186_v26 = vpop.f32.mrb[26].mxu0 }
 0x4af   : > { %v1764_v28 = vadd.f32 %v2476_v47, %v1668_v24  ;;  %v1671_v52 = vadd.f32 %v2186_v26, %v3322_v31  ;;  %v1662_v57 = vpop.f32.mrb[27].mxu0 }
 0x4b0   : > { %v1762_v61 = vadd.f32 %v2477_v13, %v1660_v37  ;;  %v1663_v55 = vadd.f32 %v1662_v57, %v3322_v31 }
 0x4b1   : > { %1796 = vst [vmem:[%s3574_s24 + $0x50] sm:$0xff] %v1764_v28  ;;  %v1765_v23 = vadd.f32 %v2478_v62, %v1671_v52  ;;  %v2492_v28 = vld [vmem:[%s2985_s30 + $0xd0] sm:$0xff] }
 0x4b2   : > { %1794 = vst [vmem:[%s3574_s24 + $0x40] sm:$0xff] %v1762_v61  ;;  %v1763_v25 = vadd.f32 %v2479_v59, %v1663_v55  ;;  %v2493_v61 = vld [vmem:[%s2985_s30 + $0xc0] sm:$0xff] }
 0x4b3   : > { %1797 = vst [vmem:[%s3574_s24 + $0x58] sm:$0xff] %v1765_v23  ;;  %v2494_v23 = vld [vmem:[%s2985_s30 + $0xd8] sm:$0xff] }
 0x4b4   : > { %1795 = vst [vmem:[%s3574_s24 + $0x48] sm:$0xff] %v1763_v25  ;;  %v2189_v39 = vpop.f32.mrb[28].mxu0  ;;  %v2495_v25 = vld [vmem:[%s2985_s30 + $0xc8] sm:$0xff] }
 0x4b5   : > { %v1684_v58 = vadd.f32 %v2189_v39, %v3322_v31  ;;  %v1675_v0 = vpop.f32.mrb[29].mxu0 }
 0x4b6   : > { %v1676_v14 = vadd.f32 %v1675_v0, %v3322_v31  ;;  %v2190_v1 = vpop.f32.mrb[30].mxu0 }
 0x4b7   : > { %v1768_v3 = vadd.f32 %v2480_v2, %v1684_v58  ;;  %v1687_v60 = vadd.f32 %v2190_v1, %v3322_v31  ;;  %v1678_v19 = vpop.f32.mrb[31].mxu0 }
 0x4b8   : > { %v1766_v4 = vadd.f32 %v2481_v6, %v1676_v14  ;;  %v1679_v11 = vadd.f32 %v1678_v19, %v3322_v31 }
 0x4b9   : > { %1800 = vst [vmem:[%s3574_s24 + $0x70] sm:$0xff] %v1768_v3  ;;  %v1769_v17 = vadd.f32 %v2482_v16, %v1687_v60  ;;  %v2496_v3 = vld [vmem:[%s2985_s30 + $0xf0] sm:$0xff] }
 0x4ba   : > { %1798 = vst [vmem:[%s3574_s24 + $0x60] sm:$0xff] %v1766_v4  ;;  %v1767_v12 = vadd.f32 %v2483_v32, %v1679_v11  ;;  %v2497_v4 = vld [vmem:[%s2985_s30 + $0xe0] sm:$0xff] }
 0x4bb   : > { %1801 = vst [vmem:[%s3574_s24 + $0x78] sm:$0xff] %v1769_v17  ;;  %v2498_v17 = vld [vmem:[%s2985_s30 + $0xf8] sm:$0xff] }
 0x4bc   : > { %1799 = vst [vmem:[%s3574_s24 + $0x68] sm:$0xff] %v1767_v12  ;;  %v2193_v41 = vpop.f32.mrb[32].mxu0  ;;  %v2499_v12 = vld [vmem:[%s2985_s30 + $0xe8] sm:$0xff] }
 0x4bd   : > { %v1700_v15 = vadd.f32 %v2193_v41, %v3322_v31  ;;  %v1691_v33 = vpop.f32.mrb[33].mxu0 }
 0x4be   : > { %v1692_v34 = vadd.f32 %v1691_v33, %v3322_v31  ;;  %v2194_v35 = vpop.f32.mrb[34].mxu0 }
 0x4bf   : > { %v1772_v45 = vadd.f32 %v2484_v40, %v1700_v15  ;;  %v1703_v8 = vadd.f32 %v2194_v35, %v3322_v31  ;;  %v1694_v9 = vpop.f32.mrb[35].mxu0 }
 0x4c0   : > { %v1770_v27 = vadd.f32 %v2485_v18, %v1692_v34  ;;  %v1695_v42 = vadd.f32 %v1694_v9, %v3322_v31 }
 0x4c1   : > { %1804 = vst [vmem:[%s3574_s24 + $0x90] sm:$0xff] %v1772_v45  ;;  %v1773_v43 = vadd.f32 %v2486_v10, %v1703_v8 }
 0x4c2   : > { %1802 = vst [vmem:[%s3574_s24 + $0x80] sm:$0xff] %v1770_v27  ;;  %v1771_v44 = vadd.f32 %v2487_v38, %v1695_v42 }
 0x4c3   : > { %1805 = vst [vmem:[%s3574_s24 + $0x98] sm:$0xff] %v1773_v43 }
 0x4c4   : > { %1803 = vst [vmem:[%s3574_s24 + $0x88] sm:$0xff] %v1771_v44  ;;  %v2197_v46 = vpop.f32.mrb[36].mxu0 }
 0x4c5   : > { %v1716_v20 = vadd.f32 %v2197_v46, %v3322_v31  ;;  %v1707_v21 = vpop.f32.mrb[37].mxu0 }
 0x4c6   : > { %v1708_v56 = vadd.f32 %v1707_v21, %v3322_v31  ;;  %v2198_v7 = vpop.f32.mrb[38].mxu0 }
 0x4c7   : > { %v1776_v48 = vadd.f32 %v2488_v29, %v1716_v20  ;;  %v1719_v63 = vadd.f32 %v2198_v7, %v3322_v31  ;;  %v1710_v53 = vpop.f32.mrb[39].mxu0 }
 0x4c8   : > { %v1774_v36 = vadd.f32 %v2489_v50, %v1708_v56  ;;  %v1711_v54 = vadd.f32 %v1710_v53, %v3322_v31 }
 0x4c9   : > { %1808 = vst [vmem:[%s3574_s24 + $0xb0] sm:$0xff] %v1776_v48  ;;  %v1777_v22 = vadd.f32 %v2490_v5, %v1719_v63 }
 0x4ca   : > { %1806 = vst [vmem:[%s3574_s24 + $0xa0] sm:$0xff] %v1774_v36  ;;  %v1775_v30 = vadd.f32 %v2491_v49, %v1711_v54 }
 0x4cb   : > { %1809 = vst [vmem:[%s3574_s24 + $0xb8] sm:$0xff] %v1777_v22 }
 0x4cc   : > { %1807 = vst [vmem:[%s3574_s24 + $0xa8] sm:$0xff] %v1775_v30  ;;  %v2201_v24 = vpop.f32.mrb[40].mxu0 }
 0x4cd   : > { %v1732_v51 = vadd.f32 %v2201_v24, %v3322_v31  ;;  %v1723_v37 = vpop.f32.mrb[41].mxu0 }
 0x4ce   : > { %v1724_v26 = vadd.f32 %v1723_v37, %v3322_v31  ;;  %v2202_v47 = vpop.f32.mrb[42].mxu0 }
 0x4cf   : > { %v1780_v52 = vadd.f32 %v2492_v28, %v1732_v51  ;;  %v1735_v57 = vadd.f32 %v2202_v47, %v3322_v31  ;;  %v1726_v13 = vpop.f32.mrb[43].mxu0 }
 0x4d0   : > { %v1778_v55 = vadd.f32 %v2493_v61, %v1724_v26  ;;  %v1727_v62 = vadd.f32 %v1726_v13, %v3322_v31 }
 0x4d1   : > { %1812 = vst [vmem:[%s3574_s24 + $0xd0] sm:$0xff] %v1780_v52  ;;  %v1781_v59 = vadd.f32 %v2494_v23, %v1735_v57 }
 0x4d2   : > { %1810 = vst [vmem:[%s3574_s24 + $0xc0] sm:$0xff] %v1778_v55  ;;  %v1779_v39 = vadd.f32 %v2495_v25, %v1727_v62 }
 0x4d3   : > { %1813 = vst [vmem:[%s3574_s24 + $0xd8] sm:$0xff] %v1781_v59 }
 0x4d4   : > { %1811 = vst [vmem:[%s3574_s24 + $0xc8] sm:$0xff] %v1779_v39  ;;  %v2205_v58 = vpop.f32.mrb[44].mxu0 }
 0x4d5   : > { %v1748_v0 = vadd.f32 %v2205_v58, %v3322_v31  ;;  %v1739_v14 = vpop.f32.mrb[45].mxu0 }
 0x4d6   : > { %v1740_v1 = vadd.f32 %v1739_v14, %v3322_v31  ;;  %v2206_v2 = vpop.f32.mrb[46].mxu0 }
 0x4d7   : > { %v1784_v60 = vadd.f32 %v2496_v3, %v1748_v0  ;;  %v1751_v19 = vadd.f32 %v2206_v2, %v3322_v31  ;;  %v1742_v6 = vpop.f32.mrb[47].mxu0 }
 0x4d8   : > { %v1782_v11 = vadd.f32 %v2497_v4, %v1740_v1  ;;  %v1743_v16 = vadd.f32 %v1742_v6, %v3322_v31 }
 0x4d9   : > { %1816 = vst [vmem:[%s3574_s24 + $0xf0] sm:$0xff] %v1784_v60  ;;  %v1785_v32 = vadd.f32 %v2498_v17, %v1751_v19 }
 0x4da   : > { %1814 = vst [vmem:[%s3574_s24 + $0xe0] sm:$0xff] %v1782_v11  ;;  %v1783_v41 = vadd.f32 %v2499_v12, %v1743_v16 }
 0x4db   : > { %1817 = vst [vmem:[%s3574_s24 + $0xf8] sm:$0xff] %v1785_v32 }
 0x4dc   : > { %1815 = vst [vmem:[%s3574_s24 + $0xe8] sm:$0xff] %v1783_v41 }
 0x4dd   : > { %2655 = shalt.err (!%p2652_p12)
}
 0x4de   : > { %s2656_s23 = scalar_lea.hbm %s3667_s22, 4096  ;;  %s2660_s7 = scalar_lea.hbm %s3721_s5, 32768 }
 0x4df   : > { %p2657_p9 = scmp.ne.s32.totalorder %s3667_s22, %s2656_s23  ;;  %p2661_p4 = scmp.lt.u32.totalorder %s3667_s22, %s3721_s5 }
 0x4e0   : > { %p2662_p8 = scmp.lt.u32.totalorder %s2660_s7, %s2656_s23  ;;  %p2664_p3 = scmp.lt.u32.totalorder %s2656_s23, %s3667_s22 }
 0x4e1   : > { %p2658_p13 = pnand %p2657_p9, %p2927_p0 }
 0x4e2   : > { %p2663_p6 = por %p2662_p8, %p2661_p4 }
 0x4e3   : > { %p2659_p10 = pneg %p2658_p13 }
 0x4e4   : > { %p2665_p5 = por %p2664_p3, %p2663_p6 }
 0x4e6   : > { %p2666_p7 = pnand %p2665_p5, %p2659_p10 }
 0x4e8   : > { %2669 = shalt.err (!%p2666_p7)
}
 0x4e9   : > { %s2728_s26 = smov 128   ;;  %s2729_s13 = smov 8  }
 0x4ea   : > { %2241 = dma.vmem_to_hbm [thread:$0]  (%p2927_p0), %s3669_s11, 4096, %s3667_s22, %s1819_s8, %s2728_s26, %s2728_s26, %s2729_s13  }
 0x4eb PF: > { %p2273_p11 = scmp.ge.s32.totalorder %s2716_s21, 2  ;;  %s1847_s15 = sand.u32 1, %s2704_s18  }
 0x4ec   : > { %p3739_p1 = scmp.ne.s32.totalorder %s3726_s25, 0  ;;  %s1848_s17 = scalar_lea.sflag [#allocation4], %s1847_s15 }
 0x4ee   : > { %p2261_p2 = pnand %p2273_p11, %p3739_p1 }
 0x4f0   : > { %2699 = dma.done.wait (!%p2261_p2), %s1848_s17, 4096  }
 0x4f1   : > { %2701 = vsyncadd (!%p2261_p2), %s1848_s17, 4294963200  ;;  %p20_p12 = scmp.ge.s32.totalorder %s2917_s14, 10   ;;  %s3740_s18 = smov %s2708_s19 }
 0x4f2   : > { %s3741_s19 = smov %s2712_s20  ;;  %s3742_s20 = smov %s2933_s28 }
 0x4f3   : > { %s3743_s21 = smov %s2917_s14  ;;  %22 = sbr.rel (!%p20_p12) target bundleno = 7 (0x7), region = 101 }
 0x4fa   :  { %1853 = vsyncpa [#allocation3], 1 }
 0x4fb   :  { %1855 = vsyncpa [#allocation3 + $0x1], 1 }
 0x4fc   :  { %1856 = vsyncpa [#allocation6], 1 }
 0x4fd   :  { %1857 = vsyncpa [#allocation9], 1 }
 0x4fe   :  { %1858 = vsyncpa [#allocation4], 1 }
 0x4ff   :  { %1860 = vsyncpa [#allocation4 + $0x1], 1 }

</bundles_post_ra>
